<compile_context>
chip_gen: v6e
topology: v6e:2x2x1
jax: 0.10.0
libtpu: 0.0.40
codegen_flags: <defaults>
</compile_context>

<pallas_src>
import functools

import jax
import jax.numpy as jnp
from jax import lax
from jax.experimental import pallas as pl
from jax.experimental.pallas import tpu as pltpu


# ------------------------------------------------------------------------------------
# Kernel: one LSTM layer, grid = (batch_tiles "parallel", time_chunks "arbitrary")
# ------------------------------------------------------------------------------------
def lstm_layer_kernel(x_ref, wih_ref, whh_ref, b_ref,
                      out_ref, hN_ref, cN_ref,
                      h_sc, c_sc, gx_sc):
    """One time-chunk of one LSTM layer for one batch tile.

    x_ref  : (Tc, Bt, E)   bf16  VMEM  (time chunk of time-major input)
    wih_ref: (E, 4H)       bf16  VMEM  (W_ih^T, full)
    whh_ref: (H, 4H)       bf16  VMEM  (W_hh^T, full)
    b_ref  : (1, 4H)       f32   VMEM  (b_ih + b_hh)
    out_ref: (Tc, Bt, H)   bf16  VMEM  (per-step hidden outputs of this chunk)
    hN_ref : (Bt, H)       f32   VMEM  (final hidden; written on the last time chunk)
    cN_ref : (Bt, H)       f32   VMEM  (final cell;   written on the last time chunk)
    h_sc, c_sc : (Bt, H)   f32   scratch (recurrent state, persists across time chunks)
    gx_sc  : (Tc, Bt, 4H)  f32   scratch (precomputed input projection + bias)
    """
    Tc, Bt, E = x_ref.shape
    H = whh_ref.shape[0]
    t_idx = pl.program_id(1)

    @pl.when(t_idx == 0)
    def _():
        h_sc[...] = jnp.zeros_like(h_sc)
        c_sc[...] = jnp.zeros_like(c_sc)

    # Hoisted input projection for the whole chunk: one large, well-shaped MXU matmul.
    # Bias is folded in here, off the serial recurrence path.
    x_flat = x_ref[...].reshape(Tc * Bt, E)
    gx_sc[...] = (jnp.dot(x_flat, wih_ref[...],
                          preferred_element_type=jnp.float32)
                  + b_ref[...]).reshape(Tc, Bt, 4 * H)

    whh = whh_ref[...]  # hoist the recurrent weight read out of the loop

    def step(t, carry):
        h, c = carry                                   # f32 (Bt, H)
        gates = (gx_sc[t]
                 + jnp.dot(h.astype(whh.dtype), whh,
                           preferred_element_type=jnp.float32))   # (Bt, 4H) f32
        # PyTorch LSTM gate order: input, forget, cell(g), output
        i_g = jax.nn.sigmoid(gates[:, 0 * H:1 * H])
        f_g = jax.nn.sigmoid(gates[:, 1 * H:2 * H])
        g_g = jnp.tanh(gates[:, 2 * H:3 * H])
        o_g = jax.nn.sigmoid(gates[:, 3 * H:4 * H])
        c_new = f_g * c + i_g * g_g
        h_new = o_g * jnp.tanh(c_new)
        out_ref[t] = h_new.astype(out_ref.dtype)
        return h_new, c_new

    unroll = Tc if Tc <= 16 else 4
    h_fin, c_fin = lax.fori_loop(0, Tc, step, (h_sc[...], c_sc[...]),
                                 unroll=unroll)
    h_sc[...] = h_fin
    c_sc[...] = c_fin

    @pl.when(t_idx == pl.num_programs(1) - 1)
    def _():
        hN_ref[...] = h_sc[...]
        cN_ref[...] = c_sc[...]


# ------------------------------------------------------------------------------------
# Host-side wrapper for one layer
# ------------------------------------------------------------------------------------
def _round_up(n, m):
    return ((n + m - 1) // m) * m


def _pick_time_chunk(T, target=128):
    tc = min(T, target)
    while T % tc:
        tc -= 1
    return tc


def _vmem_limit_bytes(Tc, Bt, E, H):
    bf, f4 = 2, 4
    tiles = 2 * (Tc * Bt * E * bf) + 2 * (Tc * Bt * H * bf)        # double-buffered in/out
    weights = 2 * ((E * 4 * H + H * 4 * H) * bf + 4 * H * f4)
    state = 2 * Bt * H * f4 + Tc * Bt * 4 * H * f4 + 4 * Bt * H * f4
    est = tiles + weights + state
    # Headroom, but stay well under v7x's 64 MiB physical VMEM.
    return int(min(max(2 * est, 16 * 1024 * 1024), 48 * 1024 * 1024))


def _lstm_layer_call(x_tbe, w_ih_T, w_hh_T, b, *, time_chunk, batch_tile):
    """x_tbe: (T, Bp, E) bf16 time-major. Returns (out (T,Bp,H) bf16, h (Bp,H) f32, c (Bp,H) f32)."""
    T, Bp, E = x_tbe.shape
    H = w_hh_T.shape[0]
    Tc = time_chunk
    Bt = batch_tile
    nt = T // Tc
    nb = Bp // Bt

    return pl.pallas_call(
        lstm_layer_kernel,
        out_shape=(
            jax.ShapeDtypeStruct((T, Bp, H), jnp.bfloat16),   # per-step hidden outputs
            jax.ShapeDtypeStruct((Bp, H), jnp.float32),       # final h
            jax.ShapeDtypeStruct((Bp, H), jnp.float32),       # final c
        ),
        grid_spec=pltpu.PrefetchScalarGridSpec(
            num_scalar_prefetch=0,
            grid=(nb, nt),
            in_specs=[
                pl.BlockSpec((Tc, Bt, E), lambda bi, ti: (ti, bi, 0)),
                pl.BlockSpec((E, 4 * H), lambda bi, ti: (0, 0)),
                pl.BlockSpec((H, 4 * H), lambda bi, ti: (0, 0)),
                pl.BlockSpec((1, 4 * H), lambda bi, ti: (0, 0)),
            ],
            out_specs=(
                pl.BlockSpec((Tc, Bt, H), lambda bi, ti: (ti, bi, 0)),
                pl.BlockSpec((Bt, H), lambda bi, ti: (bi, 0)),
                pl.BlockSpec((Bt, H), lambda bi, ti: (bi, 0)),
            ),
            scratch_shapes=[
                pltpu.VMEM((Bt, H), jnp.float32),            # h carry
                pltpu.VMEM((Bt, H), jnp.float32),            # c carry
                pltpu.VMEM((Tc, Bt, 4 * H), jnp.float32),    # hoisted input projection
            ]),
        compiler_params=pltpu.CompilerParams(
            dimension_semantics=("parallel", "arbitrary"),
            vmem_limit_bytes=_vmem_limit_bytes(Tc, Bt, E, H)),
    )(x_tbe, w_ih_T, w_hh_T, b)


# ------------------------------------------------------------------------------------
# Parameter init (mirrors the PyTorch module's shapes) and forward pass
# ------------------------------------------------------------------------------------
def init_encoder_params(key, input_dim, emb_dim, hid_dim, n_layers):
    keys = jax.random.split(key, 1 + 4 * n_layers)
    params = {"embedding": jax.random.normal(keys[0], (input_dim, emb_dim),
                                             dtype=jnp.float32) * 0.1}
    bound = 1.0 / float(jnp.sqrt(hid_dim))
    layers = []
    for layer in range(n_layers):
        in_dim = emb_dim if layer == 0 else hid_dim
        k_ih, k_hh, k_bih, k_bhh = keys[1 + 4 * layer: 1 + 4 * (layer + 1)]
        w_ih = jax.random.uniform(k_ih, (4 * hid_dim, in_dim),
                                  minval=-bound, maxval=bound, dtype=jnp.float32)
        w_hh = jax.random.uniform(k_hh, (4 * hid_dim, hid_dim),
                                  minval=-bound, maxval=bound, dtype=jnp.float32)
        b_ih = jax.random.uniform(k_bih, (4 * hid_dim,),
                                  minval=-bound, maxval=bound, dtype=jnp.float32)
        b_hh = jax.random.uniform(k_bhh, (4 * hid_dim,),
                                  minval=-bound, maxval=bound, dtype=jnp.float32)
        layers.append({
            "w_ih_T": w_ih.T,                               # (in_dim, 4H)
            "w_hh_T": w_hh.T,                               # (H, 4H)
            "b": (b_ih + b_hh).reshape(1, 4 * hid_dim),     # (1, 4H)
        })
    params["layers"] = layers
    return params


def encoder_forward(params, src):
    """Forward pass matching Encoder.forward (eval mode: dropout = identity).

    src: (B, T) int32 token ids.
    Returns: outputs (B, T, H) f32, hidden (n_layers, B, H) f32, cell (n_layers, B, H) f32.
    """
    B, T = src.shape
    H = params["layers"][0]["w_hh_T"].shape[0]

    # Sublane-friendly batch padding (bf16 packs 16 rows per vreg) and batch tiling.
    Bt = min(_round_up(B, 16), 128)
    Bp = _round_up(B, Bt)
    Tc = _pick_time_chunk(T)

    # Embedding lookup directly in time-major layout (avoids a full-tensor transpose);
    # dropout is identity.  TODO(synk): training-mode dropout not implemented.
    emb_bf16 = params["embedding"].astype(jnp.bfloat16)
    x = emb_bf16[src.T]                                     # (T, B, E) bf16
    if Bp != B:
        x = jnp.pad(x, ((0, 0), (0, Bp - B), (0, 0)))       # zero-pad batch

    h_list, c_list = [], []
    for lp in params["layers"]:
        out, h_n, c_n = _lstm_layer_call(
            x,
            lp["w_ih_T"].astype(jnp.bfloat16),
            lp["w_hh_T"].astype(jnp.bfloat16),
            lp["b"],
            time_chunk=Tc, batch_tile=Bt)
        x = out                                             # (T, Bp, H) bf16 -> next layer
        h_list.append(h_n)
        c_list.append(c_n)

    outputs = jnp.transpose(x, (1, 0, 2))[:B].astype(jnp.float32)   # (B, T, H)
    hidden = jnp.stack(h_list, axis=0)[:, :B]                        # (n_layers, B, H) f32
    cell = jnp.stack(c_list, axis=0)[:, :B]                          # (n_layers, B, H) f32
    return outputs, hidden, cell


if __name__ == "__main__":
    # Small shapes consistent with the module:
    B, T = 2, 8
    INPUT_DIM = 50     # vocab size
    EMB_DIM = 32
    HID_DIM = 32
    N_LAYERS = 2
    DROPOUT = 0.1      # inactive (inference)

    key = jax.random.PRNGKey(0)
    k_param, k_src = jax.random.split(key)
    params = init_encoder_params(k_param, INPUT_DIM, EMB_DIM, HID_DIM, N_LAYERS)
    src = jax.random.randint(k_src, (B, T), 0, INPUT_DIM, dtype=jnp.int32)

    fwd = jax.jit(encoder_forward)
    outputs, hidden, cell = fwd(params, src)
    jax.block_until_ready((outputs, hidden, cell))

    assert outputs.shape == (B, T, HID_DIM)
    assert hidden.shape == (N_LAYERS, B, HID_DIM)
    assert cell.shape == (N_LAYERS, B, HID_DIM)
    assert bool(jnp.all(jnp.isfinite(outputs)))
    assert bool(jnp.all(jnp.isfinite(hidden)))
    assert bool(jnp.all(jnp.isfinite(cell)))
    print("KERNEL_OK")
</pallas_src>

<mosaic_0001>
module attributes {stable_mosaic.version = 11 : i64} {
  func.func @lstm_layer_kernel(%arg0: i32, %arg1: i32, %arg2: memref<8x16x32xbf16, #tpu.memory_space<vmem>>, %arg3: memref<32x128xbf16, #tpu.memory_space<vmem>>, %arg4: memref<32x128xbf16, #tpu.memory_space<vmem>>, %arg5: memref<1x128xf32, #tpu.memory_space<vmem>>, %arg6: memref<8x16x32xbf16, #tpu.memory_space<vmem>>, %arg7: memref<16x32xf32, #tpu.memory_space<vmem>>, %arg8: memref<16x32xf32, #tpu.memory_space<vmem>>, %arg9: memref<16x32xf32, #tpu.memory_space<vmem>>, %arg10: memref<16x32xf32, #tpu.memory_space<vmem>>, %arg11: memref<8x16x128xf32, #tpu.memory_space<vmem>>) attributes {dimension_semantics = [#tpu.dimension_semantics<parallel>, #tpu.dimension_semantics<arbitrary>], iteration_bounds = array<i64: 1, 1>, scalar_prefetch = 0 : i64, scratch_operands = 3 : i64, tpu.core_type = #tpu.core_type<tc>, window_params = [{transform_indices = @transform_0, window_bounds = array<i64: 8, 16, 32>}, {pipeline_mode = #tpu.pipeline_mode<synchronous>, transform_indices = @transform_1, window_bounds = array<i64: 32, 128>}, {pipeline_mode = #tpu.pipeline_mode<synchronous>, transform_indices = @transform_2, window_bounds = array<i64: 32, 128>}, {pipeline_mode = #tpu.pipeline_mode<synchronous>, transform_indices = @transform_3, window_bounds = array<i64: 1, 128>}, {transform_indices = @transform_4, window_bounds = array<i64: 8, 16, 32>}, {transform_indices = @transform_5, window_bounds = array<i64: 16, 32>}, {transform_indices = @transform_6, window_bounds = array<i64: 16, 32>}]} {
    %c0_i32 = arith.constant 0 : i32
    %0 = arith.cmpi eq, %arg1, %c0_i32 : i32
    %1 = arith.extui %0 : i1 to i32
    %c0_i32_0 = arith.constant 0 : i32
    %2 = arith.cmpi ne, %1, %c0_i32_0 : i32
    scf.if %2 {
      %cst_87 = arith.constant 0.000000e+00 : f32
      %308 = vector.broadcast %cst_87 : f32 to vector<16x32xf32>
      %c0_88 = arith.constant 0 : index
      %c0_89 = arith.constant 0 : index
      %309 = vector.load %arg9[%c0_88, %c0_89] : memref<16x32xf32, #tpu.memory_space<vmem>>, vector<16x32xf32>
      tpu.vector_store %arg9[%c0_88, %c0_89], %308 {strides = array<i32>} : memref<16x32xf32, #tpu.memory_space<vmem>>, vector<16x32xf32>,
      %cst_90 = arith.constant 0.000000e+00 : f32
      %310 = vector.broadcast %cst_90 : f32 to vector<16x32xf32>
      %c0_91 = arith.constant 0 : index
      %c0_92 = arith.constant 0 : index
      %311 = vector.load %arg10[%c0_91, %c0_92] : memref<16x32xf32, #tpu.memory_space<vmem>>, vector<16x32xf32>
      tpu.vector_store %arg10[%c0_91, %c0_92], %310 {strides = array<i32>} : memref<16x32xf32, #tpu.memory_space<vmem>>, vector<16x32xf32>,
    } else {
    }
    %c0 = arith.constant 0 : index
    %c0_1 = arith.constant 0 : index
    %c0_2 = arith.constant 0 : index
    %3 = vector.load %arg2[%c0, %c0_1, %c0_2] : memref<8x16x32xbf16, #tpu.memory_space<vmem>>, vector<8x16x32xbf16>
    %4 = vector.shape_cast %3 : vector<8x16x32xbf16> to vector<128x32xbf16>
    %c0_3 = arith.constant 0 : index
    %c0_4 = arith.constant 0 : index
    %5 = vector.load %arg3[%c0_3, %c0_4] : memref<32x128xbf16, #tpu.memory_space<vmem>>, vector<32x128xbf16>
    %cst = arith.constant dense<0.000000e+00> : vector<128x128xf32>
    %6 = tpu.matmul %4, %5, %cst {dimension_numbers = #tpu.dot_dimension_numbers<[1], [0], [0], [1], [0, 0, 1, 1], [], []>} : vector<128x32xbf16>, vector<32x128xbf16>, vector<128x128xf32> -> vector<128x128xf32>
    %c0_5 = arith.constant 0 : index
    %c0_6 = arith.constant 0 : index
    %7 = vector.load %arg5[%c0_5, %c0_6] : memref<1x128xf32, #tpu.memory_space<vmem>>, vector<1x128xf32>
    %8 = vector.broadcast %7 : vector<1x128xf32> to vector<128x128xf32>
    %9 = arith.addf %6, %8 : vector<128x128xf32>
    %10 = vector.shape_cast %9 : vector<128x128xf32> to vector<8x16x128xf32>
    %c0_7 = arith.constant 0 : index
    %c0_8 = arith.constant 0 : index
    %c0_9 = arith.constant 0 : index
    %11 = vector.load %arg11[%c0_7, %c0_8, %c0_9] : memref<8x16x128xf32, #tpu.memory_space<vmem>>, vector<8x16x128xf32>
    tpu.vector_store %arg11[%c0_7, %c0_8, %c0_9], %10 {strides = array<i32>} : memref<8x16x128xf32, #tpu.memory_space<vmem>>, vector<8x16x128xf32>,
    %c0_10 = arith.constant 0 : index
    %c0_11 = arith.constant 0 : index
    %12 = vector.load %arg4[%c0_10, %c0_11] : memref<32x128xbf16, #tpu.memory_space<vmem>>, vector<32x128xbf16>
    %c0_12 = arith.constant 0 : index
    %c0_13 = arith.constant 0 : index
    %13 = vector.load %arg9[%c0_12, %c0_13] : memref<16x32xf32, #tpu.memory_space<vmem>>, vector<16x32xf32>
    %c0_14 = arith.constant 0 : index
    %c0_15 = arith.constant 0 : index
    %14 = vector.load %arg10[%c0_14, %c0_15] : memref<16x32xf32, #tpu.memory_space<vmem>>, vector<16x32xf32>
    %c0_i32_16 = arith.constant 0 : i32
    %15 = arith.index_cast %c0_i32_16 : i32 to index
    %c0_17 = arith.constant 0 : index
    %c0_18 = arith.constant 0 : index
    %16 = vector.load %arg11[%15, %c0_17, %c0_18] : memref<8x16x128xf32, #tpu.memory_space<vmem>>, vector<1x16x128xf32>
    %17 = vector.shape_cast %16 : vector<1x16x128xf32> to vector<16x128xf32>
    %18 = arith.truncf %13 : vector<16x32xf32> to vector<16x32xbf16>
    %cst_19 = arith.constant dense<0.000000e+00> : vector<16x128xf32>
    %19 = tpu.matmul %18, %12, %cst_19 {dimension_numbers = #tpu.dot_dimension_numbers<[1], [0], [0], [1], [0, 0, 1, 1], [], []>} : vector<16x32xbf16>, vector<32x128xbf16>, vector<16x128xf32> -> vector<16x128xf32>
    %20 = arith.addf %17, %19 : vector<16x128xf32>
    %21 = vector.extract_strided_slice %20 {offsets = [0, 0], sizes = [16, 32], strides = [1, 1]} : vector<16x128xf32> to vector<16x32xf32>
    %22 = arith.negf %21 : vector<16x32xf32>
    %23 = math.exp %22 : vector<16x32xf32>
    %cst_20 = arith.constant 1.000000e+00 : f32
    %24 = vector.broadcast %cst_20 : f32 to vector<16x32xf32>
    %25 = arith.addf %24, %23 : vector<16x32xf32>
    %26 = arith.divf %24, %25 : vector<16x32xf32>
    %27 = vector.extract_strided_slice %20 {offsets = [0, 32], sizes = [16, 32], strides = [1, 1]} : vector<16x128xf32> to vector<16x32xf32>
    %28 = arith.negf %27 : vector<16x32xf32>
    %29 = math.exp %28 : vector<16x32xf32>
    %cst_21 = arith.constant 1.000000e+00 : f32
    %30 = vector.broadcast %cst_21 : f32 to vector<16x32xf32>
    %31 = arith.addf %30, %29 : vector<16x32xf32>
    %32 = arith.divf %30, %31 : vector<16x32xf32>
    %33 = vector.extract_strided_slice %20 {offsets = [0, 64], sizes = [16, 32], strides = [1, 1]} : vector<16x128xf32> to vector<16x32xf32>
    %34 = math.tanh %33 : vector<16x32xf32>
    %35 = vector.extract_strided_slice %20 {offsets = [0, 96], sizes = [16, 32], strides = [1, 1]} : vector<16x128xf32> to vector<16x32xf32>
    %36 = arith.negf %35 : vector<16x32xf32>
    %37 = math.exp %36 : vector<16x32xf32>
    %cst_22 = arith.constant 1.000000e+00 : f32
    %38 = vector.broadcast %cst_22 : f32 to vector<16x32xf32>
    %39 = arith.addf %38, %37 : vector<16x32xf32>
    %40 = arith.divf %38, %39 : vector<16x32xf32>
    %41 = arith.mulf %32, %14 : vector<16x32xf32>
    %42 = arith.mulf %26, %34 : vector<16x32xf32>
    %43 = arith.addf %41, %42 : vector<16x32xf32>
    %44 = math.tanh %43 : vector<16x32xf32>
    %45 = arith.mulf %40, %44 : vector<16x32xf32>
    %46 = arith.truncf %45 : vector<16x32xf32> to vector<16x32xbf16>
    %47 = arith.index_cast %c0_i32_16 : i32 to index
    %c0_23 = arith.constant 0 : index
    %c0_24 = arith.constant 0 : index
    %48 = vector.load %arg6[%47, %c0_23, %c0_24] : memref<8x16x32xbf16, #tpu.memory_space<vmem>>, vector<1x16x32xbf16>
    %49 = vector.shape_cast %48 : vector<1x16x32xbf16> to vector<16x32xbf16>
    %50 = vector.shape_cast %46 : vector<16x32xbf16> to vector<1x16x32xbf16>
    tpu.vector_store %arg6[%47, %c0_23, %c0_24], %50 {strides = array<i32>} : memref<8x16x32xbf16, #tpu.memory_space<vmem>>, vector<1x16x32xbf16>,
    %c1_i32 = arith.constant 1 : i32
    %51 = arith.index_cast %c1_i32 : i32 to index
    %c0_25 = arith.constant 0 : index
    %c0_26 = arith.constant 0 : index
    %52 = vector.load %arg11[%51, %c0_25, %c0_26] : memref<8x16x128xf32, #tpu.memory_space<vmem>>, vector<1x16x128xf32>
    %53 = vector.shape_cast %52 : vector<1x16x128xf32> to vector<16x128xf32>
    %54 = arith.truncf %45 : vector<16x32xf32> to vector<16x32xbf16>
    %cst_27 = arith.constant dense<0.000000e+00> : vector<16x128xf32>
    %55 = tpu.matmul %54, %12, %cst_27 {dimension_numbers = #tpu.dot_dimension_numbers<[1], [0], [0], [1], [0, 0, 1, 1], [], []>} : vector<16x32xbf16>, vector<32x128xbf16>, vector<16x128xf32> -> vector<16x128xf32>
    %56 = arith.addf %53, %55 : vector<16x128xf32>
    %57 = vector.extract_strided_slice %56 {offsets = [0, 0], sizes = [16, 32], strides = [1, 1]} : vector<16x128xf32> to vector<16x32xf32>
    %58 = arith.negf %57 : vector<16x32xf32>
    %59 = math.exp %58 : vector<16x32xf32>
    %cst_28 = arith.constant 1.000000e+00 : f32
    %60 = vector.broadcast %cst_28 : f32 to vector<16x32xf32>
    %61 = arith.addf %60, %59 : vector<16x32xf32>
    %62 = arith.divf %60, %61 : vector<16x32xf32>
    %63 = vector.extract_strided_slice %56 {offsets = [0, 32], sizes = [16, 32], strides = [1, 1]} : vector<16x128xf32> to vector<16x32xf32>
    %64 = arith.negf %63 : vector<16x32xf32>
    %65 = math.exp %64 : vector<16x32xf32>
    %cst_29 = arith.constant 1.000000e+00 : f32
    %66 = vector.broadcast %cst_29 : f32 to vector<16x32xf32>
    %67 = arith.addf %66, %65 : vector<16x32xf32>
    %68 = arith.divf %66, %67 : vector<16x32xf32>
    %69 = vector.extract_strided_slice %56 {offsets = [0, 64], sizes = [16, 32], strides = [1, 1]} : vector<16x128xf32> to vector<16x32xf32>
    %70 = math.tanh %69 : vector<16x32xf32>
    %71 = vector.extract_strided_slice %56 {offsets = [0, 96], sizes = [16, 32], strides = [1, 1]} : vector<16x128xf32> to vector<16x32xf32>
    %72 = arith.negf %71 : vector<16x32xf32>
    %73 = math.exp %72 : vector<16x32xf32>
    %cst_30 = arith.constant 1.000000e+00 : f32
    %74 = vector.broadcast %cst_30 : f32 to vector<16x32xf32>
    %75 = arith.addf %74, %73 : vector<16x32xf32>
    %76 = arith.divf %74, %75 : vector<16x32xf32>
    %77 = arith.mulf %68, %43 : vector<16x32xf32>
    %78 = arith.mulf %62, %70 : vector<16x32xf32>
    %79 = arith.addf %77, %78 : vector<16x32xf32>
    %80 = math.tanh %79 : vector<16x32xf32>
    %81 = arith.mulf %76, %80 : vector<16x32xf32>
    %82 = arith.truncf %81 : vector<16x32xf32> to vector<16x32xbf16>
    %83 = arith.index_cast %c1_i32 : i32 to index
    %c0_31 = arith.constant 0 : index
    %c0_32 = arith.constant 0 : index
    %84 = vector.load %arg6[%83, %c0_31, %c0_32] : memref<8x16x32xbf16, #tpu.memory_space<vmem>>, vector<1x16x32xbf16>
    %85 = vector.shape_cast %84 : vector<1x16x32xbf16> to vector<16x32xbf16>
    %86 = vector.shape_cast %82 : vector<16x32xbf16> to vector<1x16x32xbf16>
    tpu.vector_store %arg6[%83, %c0_31, %c0_32], %86 {strides = array<i32>} : memref<8x16x32xbf16, #tpu.memory_space<vmem>>, vector<1x16x32xbf16>,
    %c2_i32 = arith.constant 2 : i32
    %87 = arith.index_cast %c2_i32 : i32 to index
    %c0_33 = arith.constant 0 : index
    %c0_34 = arith.constant 0 : index
    %88 = vector.load %arg11[%87, %c0_33, %c0_34] : memref<8x16x128xf32, #tpu.memory_space<vmem>>, vector<1x16x128xf32>
    %89 = vector.shape_cast %88 : vector<1x16x128xf32> to vector<16x128xf32>
    %90 = arith.truncf %81 : vector<16x32xf32> to vector<16x32xbf16>
    %cst_35 = arith.constant dense<0.000000e+00> : vector<16x128xf32>
    %91 = tpu.matmul %90, %12, %cst_35 {dimension_numbers = #tpu.dot_dimension_numbers<[1], [0], [0], [1], [0, 0, 1, 1], [], []>} : vector<16x32xbf16>, vector<32x128xbf16>, vector<16x128xf32> -> vector<16x128xf32>
    %92 = arith.addf %89, %91 : vector<16x128xf32>
    %93 = vector.extract_strided_slice %92 {offsets = [0, 0], sizes = [16, 32], strides = [1, 1]} : vector<16x128xf32> to vector<16x32xf32>
    %94 = arith.negf %93 : vector<16x32xf32>
    %95 = math.exp %94 : vector<16x32xf32>
    %cst_36 = arith.constant 1.000000e+00 : f32
    %96 = vector.broadcast %cst_36 : f32 to vector<16x32xf32>
    %97 = arith.addf %96, %95 : vector<16x32xf32>
    %98 = arith.divf %96, %97 : vector<16x32xf32>
    %99 = vector.extract_strided_slice %92 {offsets = [0, 32], sizes = [16, 32], strides = [1, 1]} : vector<16x128xf32> to vector<16x32xf32>
    %100 = arith.negf %99 : vector<16x32xf32>
    %101 = math.exp %100 : vector<16x32xf32>
    %cst_37 = arith.constant 1.000000e+00 : f32
    %102 = vector.broadcast %cst_37 : f32 to vector<16x32xf32>
    %103 = arith.addf %102, %101 : vector<16x32xf32>
    %104 = arith.divf %102, %103 : vector<16x32xf32>
    %105 = vector.extract_strided_slice %92 {offsets = [0, 64], sizes = [16, 32], strides = [1, 1]} : vector<16x128xf32> to vector<16x32xf32>
    %106 = math.tanh %105 : vector<16x32xf32>
    %107 = vector.extract_strided_slice %92 {offsets = [0, 96], sizes = [16, 32], strides = [1, 1]} : vector<16x128xf32> to vector<16x32xf32>
    %108 = arith.negf %107 : vector<16x32xf32>
    %109 = math.exp %108 : vector<16x32xf32>
    %cst_38 = arith.constant 1.000000e+00 : f32
    %110 = vector.broadcast %cst_38 : f32 to vector<16x32xf32>
    %111 = arith.addf %110, %109 : vector<16x32xf32>
    %112 = arith.divf %110, %111 : vector<16x32xf32>
    %113 = arith.mulf %104, %79 : vector<16x32xf32>
    %114 = arith.mulf %98, %106 : vector<16x32xf32>
    %115 = arith.addf %113, %114 : vector<16x32xf32>
    %116 = math.tanh %115 : vector<16x32xf32>
    %117 = arith.mulf %112, %116 : vector<16x32xf32>
    %118 = arith.truncf %117 : vector<16x32xf32> to vector<16x32xbf16>
    %119 = arith.index_cast %c2_i32 : i32 to index
    %c0_39 = arith.constant 0 : index
    %c0_40 = arith.constant 0 : index
    %120 = vector.load %arg6[%119, %c0_39, %c0_40] : memref<8x16x32xbf16, #tpu.memory_space<vmem>>, vector<1x16x32xbf16>
    %121 = vector.shape_cast %120 : vector<1x16x32xbf16> to vector<16x32xbf16>
    %122 = vector.shape_cast %118 : vector<16x32xbf16> to vector<1x16x32xbf16>
    tpu.vector_store %arg6[%119, %c0_39, %c0_40], %122 {strides = array<i32>} : memref<8x16x32xbf16, #tpu.memory_space<vmem>>, vector<1x16x32xbf16>,
    %c3_i32 = arith.constant 3 : i32
    %123 = arith.index_cast %c3_i32 : i32 to index
    %c0_41 = arith.constant 0 : index
    %c0_42 = arith.constant 0 : index
    %124 = vector.load %arg11[%123, %c0_41, %c0_42] : memref<8x16x128xf32, #tpu.memory_space<vmem>>, vector<1x16x128xf32>
    %125 = vector.shape_cast %124 : vector<1x16x128xf32> to vector<16x128xf32>
    %126 = arith.truncf %117 : vector<16x32xf32> to vector<16x32xbf16>
    %cst_43 = arith.constant dense<0.000000e+00> : vector<16x128xf32>
    %127 = tpu.matmul %126, %12, %cst_43 {dimension_numbers = #tpu.dot_dimension_numbers<[1], [0], [0], [1], [0, 0, 1, 1], [], []>} : vector<16x32xbf16>, vector<32x128xbf16>, vector<16x128xf32> -> vector<16x128xf32>
    %128 = arith.addf %125, %127 : vector<16x128xf32>
    %129 = vector.extract_strided_slice %128 {offsets = [0, 0], sizes = [16, 32], strides = [1, 1]} : vector<16x128xf32> to vector<16x32xf32>
    %130 = arith.negf %129 : vector<16x32xf32>
    %131 = math.exp %130 : vector<16x32xf32>
    %cst_44 = arith.constant 1.000000e+00 : f32
    %132 = vector.broadcast %cst_44 : f32 to vector<16x32xf32>
    %133 = arith.addf %132, %131 : vector<16x32xf32>
    %134 = arith.divf %132, %133 : vector<16x32xf32>
    %135 = vector.extract_strided_slice %128 {offsets = [0, 32], sizes = [16, 32], strides = [1, 1]} : vector<16x128xf32> to vector<16x32xf32>
    %136 = arith.negf %135 : vector<16x32xf32>
    %137 = math.exp %136 : vector<16x32xf32>
    %cst_45 = arith.constant 1.000000e+00 : f32
    %138 = vector.broadcast %cst_45 : f32 to vector<16x32xf32>
    %139 = arith.addf %138, %137 : vector<16x32xf32>
    %140 = arith.divf %138, %139 : vector<16x32xf32>
    %141 = vector.extract_strided_slice %128 {offsets = [0, 64], sizes = [16, 32], strides = [1, 1]} : vector<16x128xf32> to vector<16x32xf32>
    %142 = math.tanh %141 : vector<16x32xf32>
    %143 = vector.extract_strided_slice %128 {offsets = [0, 96], sizes = [16, 32], strides = [1, 1]} : vector<16x128xf32> to vector<16x32xf32>
    %144 = arith.negf %143 : vector<16x32xf32>
    %145 = math.exp %144 : vector<16x32xf32>
    %cst_46 = arith.constant 1.000000e+00 : f32
    %146 = vector.broadcast %cst_46 : f32 to vector<16x32xf32>
    %147 = arith.addf %146, %145 : vector<16x32xf32>
    %148 = arith.divf %146, %147 : vector<16x32xf32>
    %149 = arith.mulf %140, %115 : vector<16x32xf32>
    %150 = arith.mulf %134, %142 : vector<16x32xf32>
    %151 = arith.addf %149, %150 : vector<16x32xf32>
    %152 = math.tanh %151 : vector<16x32xf32>
    %153 = arith.mulf %148, %152 : vector<16x32xf32>
    %154 = arith.truncf %153 : vector<16x32xf32> to vector<16x32xbf16>
    %155 = arith.index_cast %c3_i32 : i32 to index
    %c0_47 = arith.constant 0 : index
    %c0_48 = arith.constant 0 : index
    %156 = vector.load %arg6[%155, %c0_47, %c0_48] : memref<8x16x32xbf16, #tpu.memory_space<vmem>>, vector<1x16x32xbf16>
    %157 = vector.shape_cast %156 : vector<1x16x32xbf16> to vector<16x32xbf16>
    %158 = vector.shape_cast %154 : vector<16x32xbf16> to vector<1x16x32xbf16>
    tpu.vector_store %arg6[%155, %c0_47, %c0_48], %158 {strides = array<i32>} : memref<8x16x32xbf16, #tpu.memory_space<vmem>>, vector<1x16x32xbf16>,
    %c4_i32 = arith.constant 4 : i32
    %159 = arith.index_cast %c4_i32 : i32 to index
    %c0_49 = arith.constant 0 : index
    %c0_50 = arith.constant 0 : index
    %160 = vector.load %arg11[%159, %c0_49, %c0_50] : memref<8x16x128xf32, #tpu.memory_space<vmem>>, vector<1x16x128xf32>
    %161 = vector.shape_cast %160 : vector<1x16x128xf32> to vector<16x128xf32>
    %162 = arith.truncf %153 : vector<16x32xf32> to vector<16x32xbf16>
    %cst_51 = arith.constant dense<0.000000e+00> : vector<16x128xf32>
    %163 = tpu.matmul %162, %12, %cst_51 {dimension_numbers = #tpu.dot_dimension_numbers<[1], [0], [0], [1], [0, 0, 1, 1], [], []>} : vector<16x32xbf16>, vector<32x128xbf16>, vector<16x128xf32> -> vector<16x128xf32>
    %164 = arith.addf %161, %163 : vector<16x128xf32>
    %165 = vector.extract_strided_slice %164 {offsets = [0, 0], sizes = [16, 32], strides = [1, 1]} : vector<16x128xf32> to vector<16x32xf32>
    %166 = arith.negf %165 : vector<16x32xf32>
    %167 = math.exp %166 : vector<16x32xf32>
    %cst_52 = arith.constant 1.000000e+00 : f32
    %168 = vector.broadcast %cst_52 : f32 to vector<16x32xf32>
    %169 = arith.addf %168, %167 : vector<16x32xf32>
    %170 = arith.divf %168, %169 : vector<16x32xf32>
    %171 = vector.extract_strided_slice %164 {offsets = [0, 32], sizes = [16, 32], strides = [1, 1]} : vector<16x128xf32> to vector<16x32xf32>
    %172 = arith.negf %171 : vector<16x32xf32>
    %173 = math.exp %172 : vector<16x32xf32>
    %cst_53 = arith.constant 1.000000e+00 : f32
    %174 = vector.broadcast %cst_53 : f32 to vector<16x32xf32>
    %175 = arith.addf %174, %173 : vector<16x32xf32>
    %176 = arith.divf %174, %175 : vector<16x32xf32>
    %177 = vector.extract_strided_slice %164 {offsets = [0, 64], sizes = [16, 32], strides = [1, 1]} : vector<16x128xf32> to vector<16x32xf32>
    %178 = math.tanh %177 : vector<16x32xf32>
    %179 = vector.extract_strided_slice %164 {offsets = [0, 96], sizes = [16, 32], strides = [1, 1]} : vector<16x128xf32> to vector<16x32xf32>
    %180 = arith.negf %179 : vector<16x32xf32>
    %181 = math.exp %180 : vector<16x32xf32>
    %cst_54 = arith.constant 1.000000e+00 : f32
    %182 = vector.broadcast %cst_54 : f32 to vector<16x32xf32>
    %183 = arith.addf %182, %181 : vector<16x32xf32>
    %184 = arith.divf %182, %183 : vector<16x32xf32>
    %185 = arith.mulf %176, %151 : vector<16x32xf32>
    %186 = arith.mulf %170, %178 : vector<16x32xf32>
    %187 = arith.addf %185, %186 : vector<16x32xf32>
    %188 = math.tanh %187 : vector<16x32xf32>
    %189 = arith.mulf %184, %188 : vector<16x32xf32>
    %190 = arith.truncf %189 : vector<16x32xf32> to vector<16x32xbf16>
    %191 = arith.index_cast %c4_i32 : i32 to index
    %c0_55 = arith.constant 0 : index
    %c0_56 = arith.constant 0 : index
    %192 = vector.load %arg6[%191, %c0_55, %c0_56] : memref<8x16x32xbf16, #tpu.memory_space<vmem>>, vector<1x16x32xbf16>
    %193 = vector.shape_cast %192 : vector<1x16x32xbf16> to vector<16x32xbf16>
    %194 = vector.shape_cast %190 : vector<16x32xbf16> to vector<1x16x32xbf16>
    tpu.vector_store %arg6[%191, %c0_55, %c0_56], %194 {strides = array<i32>} : memref<8x16x32xbf16, #tpu.memory_space<vmem>>, vector<1x16x32xbf16>,
    %c5_i32 = arith.constant 5 : i32
    %195 = arith.index_cast %c5_i32 : i32 to index
    %c0_57 = arith.constant 0 : index
    %c0_58 = arith.constant 0 : index
    %196 = vector.load %arg11[%195, %c0_57, %c0_58] : memref<8x16x128xf32, #tpu.memory_space<vmem>>, vector<1x16x128xf32>
    %197 = vector.shape_cast %196 : vector<1x16x128xf32> to vector<16x128xf32>
    %198 = arith.truncf %189 : vector<16x32xf32> to vector<16x32xbf16>
    %cst_59 = arith.constant dense<0.000000e+00> : vector<16x128xf32>
    %199 = tpu.matmul %198, %12, %cst_59 {dimension_numbers = #tpu.dot_dimension_numbers<[1], [0], [0], [1], [0, 0, 1, 1], [], []>} : vector<16x32xbf16>, vector<32x128xbf16>, vector<16x128xf32> -> vector<16x128xf32>
    %200 = arith.addf %197, %199 : vector<16x128xf32>
    %201 = vector.extract_strided_slice %200 {offsets = [0, 0], sizes = [16, 32], strides = [1, 1]} : vector<16x128xf32> to vector<16x32xf32>
    %202 = arith.negf %201 : vector<16x32xf32>
    %203 = math.exp %202 : vector<16x32xf32>
    %cst_60 = arith.constant 1.000000e+00 : f32
    %204 = vector.broadcast %cst_60 : f32 to vector<16x32xf32>
    %205 = arith.addf %204, %203 : vector<16x32xf32>
    %206 = arith.divf %204, %205 : vector<16x32xf32>
    %207 = vector.extract_strided_slice %200 {offsets = [0, 32], sizes = [16, 32], strides = [1, 1]} : vector<16x128xf32> to vector<16x32xf32>
    %208 = arith.negf %207 : vector<16x32xf32>
    %209 = math.exp %208 : vector<16x32xf32>
    %cst_61 = arith.constant 1.000000e+00 : f32
    %210 = vector.broadcast %cst_61 : f32 to vector<16x32xf32>
    %211 = arith.addf %210, %209 : vector<16x32xf32>
    %212 = arith.divf %210, %211 : vector<16x32xf32>
    %213 = vector.extract_strided_slice %200 {offsets = [0, 64], sizes = [16, 32], strides = [1, 1]} : vector<16x128xf32> to vector<16x32xf32>
    %214 = math.tanh %213 : vector<16x32xf32>
    %215 = vector.extract_strided_slice %200 {offsets = [0, 96], sizes = [16, 32], strides = [1, 1]} : vector<16x128xf32> to vector<16x32xf32>
    %216 = arith.negf %215 : vector<16x32xf32>
    %217 = math.exp %216 : vector<16x32xf32>
    %cst_62 = arith.constant 1.000000e+00 : f32
    %218 = vector.broadcast %cst_62 : f32 to vector<16x32xf32>
    %219 = arith.addf %218, %217 : vector<16x32xf32>
    %220 = arith.divf %218, %219 : vector<16x32xf32>
    %221 = arith.mulf %212, %187 : vector<16x32xf32>
    %222 = arith.mulf %206, %214 : vector<16x32xf32>
    %223 = arith.addf %221, %222 : vector<16x32xf32>
    %224 = math.tanh %223 : vector<16x32xf32>
    %225 = arith.mulf %220, %224 : vector<16x32xf32>
    %226 = arith.truncf %225 : vector<16x32xf32> to vector<16x32xbf16>
    %227 = arith.index_cast %c5_i32 : i32 to index
    %c0_63 = arith.constant 0 : index
    %c0_64 = arith.constant 0 : index
    %228 = vector.load %arg6[%227, %c0_63, %c0_64] : memref<8x16x32xbf16, #tpu.memory_space<vmem>>, vector<1x16x32xbf16>
    %229 = vector.shape_cast %228 : vector<1x16x32xbf16> to vector<16x32xbf16>
    %230 = vector.shape_cast %226 : vector<16x32xbf16> to vector<1x16x32xbf16>
    tpu.vector_store %arg6[%227, %c0_63, %c0_64], %230 {strides = array<i32>} : memref<8x16x32xbf16, #tpu.memory_space<vmem>>, vector<1x16x32xbf16>,
    %c6_i32 = arith.constant 6 : i32
    %231 = arith.index_cast %c6_i32 : i32 to index
    %c0_65 = arith.constant 0 : index
    %c0_66 = arith.constant 0 : index
    %232 = vector.load %arg11[%231, %c0_65, %c0_66] : memref<8x16x128xf32, #tpu.memory_space<vmem>>, vector<1x16x128xf32>
    %233 = vector.shape_cast %232 : vector<1x16x128xf32> to vector<16x128xf32>
    %234 = arith.truncf %225 : vector<16x32xf32> to vector<16x32xbf16>
    %cst_67 = arith.constant dense<0.000000e+00> : vector<16x128xf32>
    %235 = tpu.matmul %234, %12, %cst_67 {dimension_numbers = #tpu.dot_dimension_numbers<[1], [0], [0], [1], [0, 0, 1, 1], [], []>} : vector<16x32xbf16>, vector<32x128xbf16>, vector<16x128xf32> -> vector<16x128xf32>
    %236 = arith.addf %233, %235 : vector<16x128xf32>
    %237 = vector.extract_strided_slice %236 {offsets = [0, 0], sizes = [16, 32], strides = [1, 1]} : vector<16x128xf32> to vector<16x32xf32>
    %238 = arith.negf %237 : vector<16x32xf32>
    %239 = math.exp %238 : vector<16x32xf32>
    %cst_68 = arith.constant 1.000000e+00 : f32
    %240 = vector.broadcast %cst_68 : f32 to vector<16x32xf32>
    %241 = arith.addf %240, %239 : vector<16x32xf32>
    %242 = arith.divf %240, %241 : vector<16x32xf32>
    %243 = vector.extract_strided_slice %236 {offsets = [0, 32], sizes = [16, 32], strides = [1, 1]} : vector<16x128xf32> to vector<16x32xf32>
    %244 = arith.negf %243 : vector<16x32xf32>
    %245 = math.exp %244 : vector<16x32xf32>
    %cst_69 = arith.constant 1.000000e+00 : f32
    %246 = vector.broadcast %cst_69 : f32 to vector<16x32xf32>
    %247 = arith.addf %246, %245 : vector<16x32xf32>
    %248 = arith.divf %246, %247 : vector<16x32xf32>
    %249 = vector.extract_strided_slice %236 {offsets = [0, 64], sizes = [16, 32], strides = [1, 1]} : vector<16x128xf32> to vector<16x32xf32>
    %250 = math.tanh %249 : vector<16x32xf32>
    %251 = vector.extract_strided_slice %236 {offsets = [0, 96], sizes = [16, 32], strides = [1, 1]} : vector<16x128xf32> to vector<16x32xf32>
    %252 = arith.negf %251 : vector<16x32xf32>
    %253 = math.exp %252 : vector<16x32xf32>
    %cst_70 = arith.constant 1.000000e+00 : f32
    %254 = vector.broadcast %cst_70 : f32 to vector<16x32xf32>
    %255 = arith.addf %254, %253 : vector<16x32xf32>
    %256 = arith.divf %254, %255 : vector<16x32xf32>
    %257 = arith.mulf %248, %223 : vector<16x32xf32>
    %258 = arith.mulf %242, %250 : vector<16x32xf32>
    %259 = arith.addf %257, %258 : vector<16x32xf32>
    %260 = math.tanh %259 : vector<16x32xf32>
    %261 = arith.mulf %256, %260 : vector<16x32xf32>
    %262 = arith.truncf %261 : vector<16x32xf32> to vector<16x32xbf16>
    %263 = arith.index_cast %c6_i32 : i32 to index
    %c0_71 = arith.constant 0 : index
    %c0_72 = arith.constant 0 : index
    %264 = vector.load %arg6[%263, %c0_71, %c0_72] : memref<8x16x32xbf16, #tpu.memory_space<vmem>>, vector<1x16x32xbf16>
    %265 = vector.shape_cast %264 : vector<1x16x32xbf16> to vector<16x32xbf16>
    %266 = vector.shape_cast %262 : vector<16x32xbf16> to vector<1x16x32xbf16>
    tpu.vector_store %arg6[%263, %c0_71, %c0_72], %266 {strides = array<i32>} : memref<8x16x32xbf16, #tpu.memory_space<vmem>>, vector<1x16x32xbf16>,
    %c7_i32 = arith.constant 7 : i32
    %267 = arith.index_cast %c7_i32 : i32 to index
    %c0_73 = arith.constant 0 : index
    %c0_74 = arith.constant 0 : index
    %268 = vector.load %arg11[%267, %c0_73, %c0_74] : memref<8x16x128xf32, #tpu.memory_space<vmem>>, vector<1x16x128xf32>
    %269 = vector.shape_cast %268 : vector<1x16x128xf32> to vector<16x128xf32>
    %270 = arith.truncf %261 : vector<16x32xf32> to vector<16x32xbf16>
    %cst_75 = arith.constant dense<0.000000e+00> : vector<16x128xf32>
    %271 = tpu.matmul %270, %12, %cst_75 {dimension_numbers = #tpu.dot_dimension_numbers<[1], [0], [0], [1], [0, 0, 1, 1], [], []>} : vector<16x32xbf16>, vector<32x128xbf16>, vector<16x128xf32> -> vector<16x128xf32>
    %272 = arith.addf %269, %271 : vector<16x128xf32>
    %273 = vector.extract_strided_slice %272 {offsets = [0, 0], sizes = [16, 32], strides = [1, 1]} : vector<16x128xf32> to vector<16x32xf32>
    %274 = arith.negf %273 : vector<16x32xf32>
    %275 = math.exp %274 : vector<16x32xf32>
    %cst_76 = arith.constant 1.000000e+00 : f32
    %276 = vector.broadcast %cst_76 : f32 to vector<16x32xf32>
    %277 = arith.addf %276, %275 : vector<16x32xf32>
    %278 = arith.divf %276, %277 : vector<16x32xf32>
    %279 = vector.extract_strided_slice %272 {offsets = [0, 32], sizes = [16, 32], strides = [1, 1]} : vector<16x128xf32> to vector<16x32xf32>
    %280 = arith.negf %279 : vector<16x32xf32>
    %281 = math.exp %280 : vector<16x32xf32>
    %cst_77 = arith.constant 1.000000e+00 : f32
    %282 = vector.broadcast %cst_77 : f32 to vector<16x32xf32>
    %283 = arith.addf %282, %281 : vector<16x32xf32>
    %284 = arith.divf %282, %283 : vector<16x32xf32>
    %285 = vector.extract_strided_slice %272 {offsets = [0, 64], sizes = [16, 32], strides = [1, 1]} : vector<16x128xf32> to vector<16x32xf32>
    %286 = math.tanh %285 : vector<16x32xf32>
    %287 = vector.extract_strided_slice %272 {offsets = [0, 96], sizes = [16, 32], strides = [1, 1]} : vector<16x128xf32> to vector<16x32xf32>
    %288 = arith.negf %287 : vector<16x32xf32>
    %289 = math.exp %288 : vector<16x32xf32>
    %cst_78 = arith.constant 1.000000e+00 : f32
    %290 = vector.broadcast %cst_78 : f32 to vector<16x32xf32>
    %291 = arith.addf %290, %289 : vector<16x32xf32>
    %292 = arith.divf %290, %291 : vector<16x32xf32>
    %293 = arith.mulf %284, %259 : vector<16x32xf32>
    %294 = arith.mulf %278, %286 : vector<16x32xf32>
    %295 = arith.addf %293, %294 : vector<16x32xf32>
    %296 = math.tanh %295 : vector<16x32xf32>
    %297 = arith.mulf %292, %296 : vector<16x32xf32>
    %298 = arith.truncf %297 : vector<16x32xf32> to vector<16x32xbf16>
    %299 = arith.index_cast %c7_i32 : i32 to index
    %c0_79 = arith.constant 0 : index
    %c0_80 = arith.constant 0 : index
    %300 = vector.load %arg6[%299, %c0_79, %c0_80] : memref<8x16x32xbf16, #tpu.memory_space<vmem>>, vector<1x16x32xbf16>
    %301 = vector.shape_cast %300 : vector<1x16x32xbf16> to vector<16x32xbf16>
    %302 = vector.shape_cast %298 : vector<16x32xbf16> to vector<1x16x32xbf16>
    tpu.vector_store %arg6[%299, %c0_79, %c0_80], %302 {strides = array<i32>} : memref<8x16x32xbf16, #tpu.memory_space<vmem>>, vector<1x16x32xbf16>,
    %c8_i32 = arith.constant 8 : i32
    %c0_81 = arith.constant 0 : index
    %c0_82 = arith.constant 0 : index
    %303 = vector.load %arg9[%c0_81, %c0_82] : memref<16x32xf32, #tpu.memory_space<vmem>>, vector<16x32xf32>
    tpu.vector_store %arg9[%c0_81, %c0_82], %297 {strides = array<i32>} : memref<16x32xf32, #tpu.memory_space<vmem>>, vector<16x32xf32>,
    %c0_83 = arith.constant 0 : index
    %c0_84 = arith.constant 0 : index
    %304 = vector.load %arg10[%c0_83, %c0_84] : memref<16x32xf32, #tpu.memory_space<vmem>>, vector<16x32xf32>
    tpu.vector_store %arg10[%c0_83, %c0_84], %295 {strides = array<i32>} : memref<16x32xf32, #tpu.memory_space<vmem>>, vector<16x32xf32>,
    %c0_i32_85 = arith.constant 0 : i32
    %305 = arith.cmpi eq, %arg1, %c0_i32_85 : i32
    %306 = arith.extui %305 : i1 to i32
    %c0_i32_86 = arith.constant 0 : i32
    %307 = arith.cmpi ne, %306, %c0_i32_86 : i32
    scf.if %307 {
      %c0_87 = arith.constant 0 : index
      %c0_88 = arith.constant 0 : index
      %308 = vector.load %arg9[%c0_87, %c0_88] : memref<16x32xf32, #tpu.memory_space<vmem>>, vector<16x32xf32>
      %c0_89 = arith.constant 0 : index
      %c0_90 = arith.constant 0 : index
      %309 = vector.load %arg7[%c0_89, %c0_90] : memref<16x32xf32, #tpu.memory_space<vmem>>, vector<16x32xf32>
      tpu.vector_store %arg7[%c0_89, %c0_90], %308 {strides = array<i32>} : memref<16x32xf32, #tpu.memory_space<vmem>>, vector<16x32xf32>,
      %c0_91 = arith.constant 0 : index
      %c0_92 = arith.constant 0 : index
      %310 = vector.load %arg10[%c0_91, %c0_92] : memref<16x32xf32, #tpu.memory_space<vmem>>, vector<16x32xf32>
      %c0_93 = arith.constant 0 : index
      %c0_94 = arith.constant 0 : index
      %311 = vector.load %arg8[%c0_93, %c0_94] : memref<16x32xf32, #tpu.memory_space<vmem>>, vector<16x32xf32>
      tpu.vector_store %arg8[%c0_93, %c0_94], %310 {strides = array<i32>} : memref<16x32xf32, #tpu.memory_space<vmem>>, vector<16x32xf32>,
    } else {
    }
    return
  }
  func.func @transform_0(%arg0: i32, %arg1: i32) -> (i32, i32, i32) {
    %c0_i32 = arith.constant 0 : i32
    %c0_i32_0 = arith.constant 0 : i32
    return %arg1, %arg0, %c0_i32 : i32, i32, i32
  }
  func.func @transform_1(%arg0: i32, %arg1: i32) -> (i32, i32) {
    %c0_i32 = arith.constant 0 : i32
    %c0_i32_0 = arith.constant 0 : i32
    %c0_i32_1 = arith.constant 0 : i32
    return %c0_i32, %c0_i32_0 : i32, i32
  }
  func.func @transform_2(%arg0: i32, %arg1: i32) -> (i32, i32) {
    %c0_i32 = arith.constant 0 : i32
    %c0_i32_0 = arith.constant 0 : i32
    %c0_i32_1 = arith.constant 0 : i32
    return %c0_i32, %c0_i32_0 : i32, i32
  }
  func.func @transform_3(%arg0: i32, %arg1: i32) -> (i32, i32) {
    %c0_i32 = arith.constant 0 : i32
    %c0_i32_0 = arith.constant 0 : i32
    %c0_i32_1 = arith.constant 0 : i32
    return %c0_i32, %c0_i32_0 : i32, i32
  }
  func.func @transform_4(%arg0: i32, %arg1: i32) -> (i32, i32, i32) {
    %c0_i32 = arith.constant 0 : i32
    %c0_i32_0 = arith.constant 0 : i32
    return %arg1, %arg0, %c0_i32 : i32, i32, i32
  }
  func.func @transform_5(%arg0: i32, %arg1: i32) -> (i32, i32) {
    %c0_i32 = arith.constant 0 : i32
    %c0_i32_0 = arith.constant 0 : i32
    return %arg0, %c0_i32 : i32, i32
  }
  func.func @transform_6(%arg0: i32, %arg1: i32) -> (i32, i32) {
    %c0_i32 = arith.constant 0 : i32
    %c0_i32_0 = arith.constant 0 : i32
    return %arg0, %c0_i32 : i32, i32
  }
}

</mosaic_0001>

<bundles_post_ra>
// kernel: encoder_forward.2
= control target key start
LH: loop header
LB: loop body
LE: loop exit
PB: predicated region body
PF: predicated region fallthrough
CT: control target
= control target key end

     0   :  { %vm25_vm0 = vcmask 261120   ;;  %v1582_v0 = vmov 0.0   ;;  %vm1583_vm1 = vmmov 0   ;;  %s1585_s10 = smov 64   ;;  %vm384_vm2 = vcmask 257024   ;;  %s2024_s1 = inlined_call_operand.vmem [shape: bf16[32,128], index: 1, kind: input, shape index: {}]   ;;  %s2025_s2 = inlined_call_operand.vmem [shape: bf16[32,128], index: 2, kind: input, shape index: {}]   ;;  %s2026_s0 = inlined_call_operand.vmem [shape: bf16[8,16,32], index: 0, kind: input, shape index: {}]   ;;  %s2027_s3 = inlined_call_operand.vmem [shape: f32[1,128], index: 3, kind: input, shape index: {}]   ;;  %s2028_s4 = inlined_call_operand.vmem [shape: bf16[8,16,32], index: 4, kind: output, shape index: {0}]   ;;  %s2029_s6 = inlined_call_operand.vmem [shape: f32[16,32], index: 6, kind: output, shape index: {2}]   ;;  %s2030_s5 = inlined_call_operand.vmem [shape: f32[16,32], index: 5, kind: output, shape index: {1}]  }
   0x1   :  { %1373 = vmatprep.subr.bf16.mxu1 %v1582_v0  ;;  %v1442_v1 = vld [vmem:[%s2024_s1 + $0x8] sm:$0xff]   ;;  %1377 = vmatprep.mubr.msk.bf16.mxu1 %vm1583_vm1, %v1582_v0  ;;  %26 = vst.msk [vmem:[#allocation2] sm:$0xff] %vm25_vm0, %v1582_v0  ;;  %27 = vst.msk [vmem:[#allocation2 + $0x8] sm:$0xff] %vm25_vm0, %v1582_v0  ;;  %v1444_v3 = vld [vmem:[%s2024_s1] sm:$0xff]   ;;  %s1584_s1 = smov 32  }
   0x2   :  { %28 = vst.msk [vmem:[#allocation3] sm:$0xff] %vm25_vm0, %v1582_v0  ;;  %29 = vst.msk [vmem:[#allocation3 + $0x8] sm:$0xff] %vm25_vm0, %v1582_v0  ;;  %v1639_v2 = vld [vmem:[%s2025_s2 + $0x8] sm:$0xff]   ;;  %1353 = vmatprep.subr.bf16.mxu0 %v1442_v1  ;;  %v1648_v4 = vld [vmem:[%s2025_s2] sm:$0xff]  }
   0x3   :  { %1374 = vmatpush3.bf16.msra.mxu1 %v1639_v2  ;;  %1354 = vmatpush3.bf16.msra.mxu0 %v1442_v1  ;;  %v1446_v5 = vld [vmem:[%s2026_s0] sm:$0xff]   ;;  %v1447_v6 = vld [vmem:[%s2026_s0 + $0x8] sm:$0xff]  }
   0x4   :  { %1375 = vmatprep.subr.bf16.mxu1 %v1582_v0  ;;  %1355 = vmatprep.subr.bf16.mxu0 %v1444_v3  ;;  %v1680_v14 = vld [vmem:[%s2027_s3] ss:$0 sm:$0xff] }
   0x5   :  { %1357 = vmatprep.mubr.msk.bf16.mxu0 %vm25_vm0, %v1446_v5 }
   0x7   :  { %1376 = vmatpush3.bf16.msra.mxu1 %v1648_v4  ;;  %1356 = vmatpush3.bf16.msra.mxu0 %v1444_v3 }
   0x8   :  { %v251_v7 = vld [vmem:[#allocation2] sm:$0xff]  ;;  %v252_v8 = vld [vmem:[#allocation2 + $0x8] sm:$0xff]  ;;  %1381 = vmatprep.subr.bf16.mxu1 %v1582_v0  ;;  %1405 = vmatprep.subr.bf16.mxu0 %v1582_v0 }
   0x9   :  { %v253_v9 = vld [vmem:[#allocation3] sm:$0xff]  ;;  %v257_v10 = vpack.c.bf16 %v252_v8, %v251_v7  ;;  %v254_v11 = vld [vmem:[#allocation3 + $0x8] sm:$0xff] }
   0xa   :  { %332 = vrot.lane.b32.xlu1 %v253_v9, %s1584_s1  ;;  %1358 = vmatmul.mubr.msk.bf16.vlgmr.msra.gmra.mxu0 %vm25_vm0, %v1447_v6 }
   0xb   :  { %1378 = vmatmul.mubr.msk.bf16.vlgmr.msra.gmra.mxu1 %vm25_vm0, %v257_v10  ;;  %1406 = vmatpush3.bf16.msra.mxu0 %v1639_v2 }
   0xc   :  { %1382 = vmatpush3.bf16.msra.mxu1 %v1639_v2  ;;  %1385 = vmatprep.mubr.msk.bf16.mxu1 %vm1583_vm1, %v1582_v0 }
   0xd   :  { %1383 = vmatprep.subr.bf16.mxu1 %v1582_v0  ;;  %1407 = vmatprep.subr.bf16.mxu0 %v1582_v0 }
   0xe   :  { %334 = vrot.lane.b32.xlu1 %v254_v11, %s1584_s1 }
   0xf   :  { %1408 = vmatpush3.bf16.msra.mxu0 %v1648_v4 }
  0x10   :  { %1384 = vmatpush3.bf16.msra.mxu1 %v1648_v4  ;;  %1421 = vmatprep.subr.bf16.mxu0 %v1582_v0 }
  0x11   :  { %1389 = vmatprep.subr.bf16.mxu1 %v1582_v0 }
  0x7c   :  { %v333_v39 = vpop.permute.xlu1 %332 }
  0x80   :  { %v335_v41 = vpop.permute.xlu1 %334 }
  0xca   :  { %v1675_v13 = vpop.f32.mrf.mxu0 }
  0xcb   :  { %v307_v12 = vpop.f32.mrf.mxu1  ;;  %v177_v55 = vadd.f32 %v1675_v13, %v1680_v14 }
  0xcc   :  { %v168_v16 = vpop.f32.mrf.mxu0 }
  0xcd   :  { %v1379_v15 = vpop.f32.mrf.mxu1  ;;  %v169_v17 = vadd.f32 %v1680_v14, %v168_v16 }
  0xce   :  { %v1360_v19 = vpop.f32.mrf.mxu0 }
  0xcf   :  { %v310_v18 = vpop.f32.mrf.mxu1  ;;  %v314_v20 = vadd.f32 %v307_v12, %v169_v17  ;;  %v180_v59 = vadd.f32 %v1360_v19, %v1680_v14 }
  0xd0   :  { %v171_v22 = vpop.f32.mrf.mxu0 }
  0xd1   :  { %v1380_v21 = vpop.f32.mrf.mxu1  ;;  %1454 = vtanh.f32 %v314_v20  ;;  %v172_v23 = vadd.f32 %v1680_v14, %v171_v22  ;;  %v1250_v27 = vmul.f32 -1.442695, %v314_v20 }
  0xd3   :  { %v315_v24 = vadd.f32 %v310_v18, %v172_v23  ;;  %v1448_v23 = vld [vmem:[%s2026_s0 + $0x10] sm:$0xff]  }
  0xd4   :  { %1361 = vmatprep.mubr.msk.bf16.mxu0 %vm25_vm0, %v1448_v23 }
  0xd5   :  { %1456 = vtanh.f32 %v315_v24  ;;  %v1251_v28 = vmul.f32 -1.442695, %v315_v24  ;;  %v1449_v24 = vld [vmem:[%s2026_s0 + $0x18] sm:$0xff]  }
  0xd6   :  { %1458 = vpow2.f32 %v1250_v27  ;;  %1362 = vmatmul.mubr.msk.bf16.gmra.mxu0 %vm25_vm0, %v1449_v24 }
  0xd7   :  { %1460 = vpow2.f32 %v1251_v28 }
  0xde   :  { %v1455_v25 = vpop.eup %1454 }
  0xdf   :  { %342 = vrot.lane.b32.xlu0 %v1455_v25, %s1585_s10 }
  0xe2   :  { %v1457_v26 = vpop.eup %1456 }
  0xe3   :  { %344 = vrot.lane.b32.xlu0 %v1457_v26, %s1585_s10  ;;  %v1459_v29 = vpop.eup %1458 }
  0xe4   :  { %v322_v30 = vadd.f32 1.0, %v1459_v29  ;;  %v1461_v31 = vpop.eup %1460 }
  0xe5   :  { %v323_v32 = vadd.f32 1.0, %v1461_v31 }
  0xe6   :  { %1462 = vrcp.f32 %v322_v30 }
  0xe7   :  { %1464 = vrcp.f32 %v323_v32 }
  0xf3   :  { %v1463_v33 = vpop.eup %1462 }
  0xf4   :  { %v1465_v36 = vpop.eup %1464  ;;  %v338_v40 = vmul.f32 %v1463_v33, %v333_v39 }
  0xf5   :  { %v339_v44 = vmul.f32 %v1465_v36, %v335_v41 }
 0x151   :  { %v343_v34 = vpop.permute.xlu0 %342 }
 0x152   :  { %v348_v35 = vmul.f32 %v1463_v33, %v343_v34 }
 0x154   :  { %352 = vrot.lane.b32.xlu0 %v348_v35, %s1584_s1 }
 0x155   :  { %v345_v37 = vpop.permute.xlu0 %344 }
 0x156   :  { %v349_v38 = vmul.f32 %v1465_v36, %v345_v37 }
 0x158   :  { %354 = vrot.lane.b32.xlu1 %v349_v38, %s1584_s1 }
 0x1c6   :  { %v353_v42 = vpop.permute.xlu0 %352 }
 0x1c7   :  { %v358_v43 = vadd.f32 %v353_v42, %v338_v40 }
 0x1c9   :  { %1466 = vtanh.f32 %v358_v43 }
 0x1ca   :  { %v355_v45 = vpop.permute.xlu1 %354 }
 0x1cb   :  { %v359_v46 = vadd.f32 %v355_v45, %v339_v44 }
 0x1cd   :  { %1468 = vtanh.f32 %v359_v46 }
 0x1d6   :  { %v1467_v47 = vpop.eup %1466 }
 0x1d7   :  { %364 = vrot.lane.b32.xlu0 %v1467_v47, %s1585_s10 }
 0x1da   :  { %v1469_v48 = vpop.eup %1468 }
 0x1db   :  { %366 = vrot.lane.b32.xlu1 %v1469_v48, %s1585_s10 }
 0x249   :  { %v365_v49 = vpop.permute.xlu0 %364 }
 0x24a   :  { %v1690_v51 = vmul.f32 %v1463_v33, %v365_v49  ;;  %v1363_v33 = vpop.f32.mrf.mxu0 }
 0x24c   :  { %v184_v34 = vpop.f32.mrf.mxu0 }
 0x24d   :  { %v367_v50 = vpop.permute.xlu1 %366 }
 0x24e   :  { %v1692_v52 = vmul.f32 %v1465_v36, %v367_v50  ;;  %v1741_v35 = vpop.f32.mrf.mxu0  ;;  %v185_v36 = vadd.f32 %v1680_v14, %v184_v34 }
 0x250   :  { %v372_v53 = vpack.c.bf16 %v1692_v52, %v1690_v51  ;;  %v187_v37 = vpop.f32.mrf.mxu0 }
 0x251   :  { %v188_v41 = vadd.f32 %v1680_v14, %v187_v37 }
 0x252   :  { %390 = vrot.lane.b32.xlu0 %v372_v53, %s1584_s1 }
 0x2c4   :  { %v391_v54 = vpop.permute.xlu0 %390 }
 0x2c5   :  { %1386 = vmatmul.mubr.msk.bf16.vlgmr.msra.gmra.mxu1 %vm25_vm0, %v391_v54 }
 0x2c6   :  { %1390 = vmatpush3.bf16.msra.mxu1 %v1639_v2  ;;  %1393 = vmatprep.mubr.msk.bf16.mxu1 %vm1583_vm1, %v1582_v0 }
 0x2c7   :  { %1391 = vmatprep.subr.bf16.mxu1 %v1582_v0 }
 0x2ca   :  { %1392 = vmatpush3.bf16.msra.mxu1 %v1648_v4 }
 0x2cb   :  { %1397 = vmatprep.subr.bf16.mxu1 %v1582_v0 }
 0x385   :  { %v429_v56 = vpop.f32.mrf.mxu1 }
 0x386   :  { %v436_v57 = vadd.f32 %v429_v56, %v177_v55 }
 0x387   :  { %v1387_v58 = vpop.f32.mrf.mxu1 }
 0x388   :  { %1470 = vtanh.f32 %v436_v57  ;;  %v1255_v3 = vmul.f32 -1.442695, %v436_v57 }
 0x389   :  { %v432_v60 = vpop.f32.mrf.mxu1 }
 0x38a   :  { %v437_v61 = vadd.f32 %v432_v60, %v180_v59 }
 0x38b   :  { %v1388_v62 = vpop.f32.mrf.mxu1 }
 0x38c   :  { %1472 = vtanh.f32 %v437_v61  ;;  %v1256_v5 = vmul.f32 -1.442695, %v437_v61 }
 0x38d   :  { %1474 = vpow2.f32 %v1255_v3 }
 0x38e   :  { %1476 = vpow2.f32 %v1256_v5 }
 0x395   :  { %v1471_v63 = vpop.eup %1470 }
 0x396   :  { %456 = vrot.lane.b32.xlu1 %v1471_v63, %s1585_s10 }
 0x399   :  { %v1473_v1 = vpop.eup %1472 }
 0x39a   :  { %458 = vrot.lane.b32.xlu0 %v1473_v1, %s1585_s10  ;;  %v1475_v6 = vpop.eup %1474 }
 0x39b   :  { %v444_v7 = vadd.f32 1.0, %v1475_v6  ;;  %v1477_v8 = vpop.eup %1476 }
 0x39c   :  { %v445_v9 = vadd.f32 1.0, %v1477_v8 }
 0x39d   :  { %1478 = vrcp.f32 %v444_v7 }
 0x39e   :  { %1480 = vrcp.f32 %v445_v9 }
 0x3aa   :  { %v1479_v10 = vpop.eup %1478 }
 0x3ab   :  { %v1481_v13 = vpop.eup %1480  ;;  %v452_v17 = vmul.f32 %v1479_v10, %v358_v43 }
 0x3ac   :  { %v453_v20 = vmul.f32 %v1481_v13, %v359_v46 }
 0x408   :  { %v457_v11 = vpop.permute.xlu1 %456 }
 0x409   :  { %v462_v12 = vmul.f32 %v1479_v10, %v457_v11 }
 0x40b   :  { %466 = vrot.lane.b32.xlu1 %v462_v12, %s1584_s1 }
 0x40c   :  { %v459_v15 = vpop.permute.xlu0 %458 }
 0x40d   :  { %v463_v16 = vmul.f32 %v1481_v13, %v459_v15  ;;  %v193_v15 = vadd.f32 %v1363_v33, %v1680_v14 }
 0x40f   :  { %468 = vrot.lane.b32.xlu0 %v463_v16, %s1584_s1 }
 0x47d   :  { %v467_v18 = vpop.permute.xlu1 %466 }
 0x47e   :  { %v1711_v19 = vadd.f32 %v467_v18, %v452_v17 }
 0x480   :  { %1482 = vtanh.f32 %v1711_v19 }
 0x481   :  { %v469_v21 = vpop.permute.xlu0 %468 }
 0x482   :  { %v1714_v22 = vadd.f32 %v469_v21, %v453_v20 }
 0x484   :  { %1484 = vtanh.f32 %v1714_v22 }
 0x48d   :  { %v1483_v25 = vpop.eup %1482 }
 0x48e   :  { %478 = vrot.lane.b32.xlu1 %v1483_v25, %s1585_s10 }
 0x491   :  { %v1485_v26 = vpop.eup %1484 }
 0x492   :  { %480 = vrot.lane.b32.xlu0 %v1485_v26, %s1585_s10 }
 0x500   :  { %v479_v27 = vpop.permute.xlu1 %478 }
 0x501   :  { %v1727_v29 = vmul.f32 %v1479_v10, %v479_v27 }
 0x504   :  { %v481_v28 = vpop.permute.xlu0 %480 }
 0x505   :  { %v1729_v30 = vmul.f32 %v1481_v13, %v481_v28 }
 0x507   :  { %v486_v31 = vpack.c.bf16 %v1729_v30, %v1727_v29 }
 0x509   :  { %504 = vrot.lane.b32.xlu1 %v486_v31, %s1584_s1 }
 0x57b   :  { %v505_v32 = vpop.permute.xlu1 %504 }
 0x57c   :  { %1394 = vmatmul.mubr.msk.bf16.vlgmr.msra.gmra.mxu1 %vm25_vm0, %v505_v32 }
 0x57d   :  { %1398 = vmatpush3.bf16.msra.mxu1 %v1639_v2  ;;  %1401 = vmatprep.mubr.msk.bf16.mxu1 %vm1583_vm1, %v1582_v0 }
 0x57e   :  { %1399 = vmatprep.subr.bf16.mxu1 %v1582_v0 }
 0x581   :  { %1400 = vmatpush3.bf16.msra.mxu1 %v1648_v4 }
 0x582   :  { %1413 = vmatprep.subr.bf16.mxu1 %v1582_v0 }
 0x63c   :  { %v543_v38 = vpop.f32.mrf.mxu1 }
 0x63d   :  { %v550_v39 = vadd.f32 %v543_v38, %v185_v36 }
 0x63e   :  { %v1395_v40 = vpop.f32.mrf.mxu1 }
 0x63f   :  { %1486 = vtanh.f32 %v550_v39  ;;  %v1262_v47 = vmul.f32 -1.442695, %v550_v39 }
 0x640   :  { %v546_v42 = vpop.f32.mrf.mxu1 }
 0x641   :  { %v551_v43 = vadd.f32 %v546_v42, %v188_v41 }
 0x642   :  { %v1396_v44 = vpop.f32.mrf.mxu1 }
 0x643   :  { %1488 = vtanh.f32 %v551_v43  ;;  %v1263_v48 = vmul.f32 -1.442695, %v551_v43 }
 0x644   :  { %1490 = vpow2.f32 %v1262_v47  ;;  %v1452_v47 = vld [vmem:[%s2026_s0 + $0x30] sm:$0xff]  }
 0x645   :  { %1492 = vpow2.f32 %v1263_v48 }
 0x64c   :  { %v1487_v45 = vpop.eup %1486 }
 0x64d   :  { %570 = vrot.lane.b32.xlu0 %v1487_v45, %s1585_s10  ;;  %v1450_v45 = vld [vmem:[%s2026_s0 + $0x20] sm:$0xff]  }
 0x64e   :  { %1365 = vmatprep.mubr.msk.bf16.mxu0 %vm25_vm0, %v1450_v45 }
 0x650   :  { %v1489_v46 = vpop.eup %1488 }
 0x651   :  { %572 = vrot.lane.b32.xlu1 %v1489_v46, %s1585_s10  ;;  %v1491_v49 = vpop.eup %1490  ;;  %v1451_v46 = vld [vmem:[%s2026_s0 + $0x28] sm:$0xff]  }
 0x652   :  { %v558_v50 = vadd.f32 1.0, %v1491_v49  ;;  %v1493_v53 = vpop.eup %1492  ;;  %1366 = vmatmul.mubr.msk.bf16.gmra.mxu0 %vm25_vm0, %v1451_v46  ;;  %v1453_v49 = vld [vmem:[%s2026_s0 + $0x38] sm:$0xff]   ;;  %s1586_s0 = smov 96  }
 0x653   :  { %v559_v54 = vadd.f32 1.0, %v1493_v53  ;;  %1369 = vmatprep.mubr.msk.bf16.mxu0 %vm25_vm0, %v1452_v47 }
 0x654   :  { %1494 = vrcp.f32 %v558_v50 }
 0x655   :  { %1496 = vrcp.f32 %v559_v54 }
 0x65a   :  { %1370 = vmatmul.mubr.msk.bf16.gmra.mxu0 %vm25_vm0, %v1453_v49 }
 0x65b   :  { %1409 = vmatprep.mubr.msk.bf16.mxu0 %vm1583_vm1, %v1582_v0 }
 0x661   :  { %v1495_v55 = vpop.eup %1494 }
 0x662   :  { %v1497_v58 = vpop.eup %1496  ;;  %v566_v61 = vmul.f32 %v1495_v55, %v1711_v19  ;;  %v196_v19 = vadd.f32 %v1741_v35, %v1680_v14 }
 0x663   :  { %v567_v1 = vmul.f32 %v1497_v58, %v1714_v22 }
 0x6bf   :  { %v571_v56 = vpop.permute.xlu0 %570 }
 0x6c0   :  { %v576_v57 = vmul.f32 %v1495_v55, %v571_v56 }
 0x6c2   :  { %580 = vrot.lane.b32.xlu0 %v576_v57, %s1584_s1 }
 0x6c3   :  { %v573_v59 = vpop.permute.xlu1 %572 }
 0x6c4   :  { %v577_v60 = vmul.f32 %v1497_v58, %v573_v59 }
 0x6c6   :  { %582 = vrot.lane.b32.xlu1 %v577_v60, %s1584_s1 }
 0x712   :  { %v1813_v59 = vpop.f32.mrf.mxu0 }
 0x713   :  { %v209_v47 = vadd.f32 %v1813_v59, %v1680_v14 }
 0x714   :  { %v200_v60 = vpop.f32.mrf.mxu0 }
 0x734   :  { %v581_v62 = vpop.permute.xlu0 %580 }
 0x735   :  { %v586_v63 = vadd.f32 %v581_v62, %v566_v61  ;;  %v1815_v61 = vpop.f32.mrf.mxu0 }
 0x737   :  { %1498 = vtanh.f32 %v586_v63  ;;  %v203_v62 = vpop.f32.mrf.mxu0 }
 0x738   :  { %v583_v3 = vpop.permute.xlu1 %582 }
 0x739   :  { %v587_v5 = vadd.f32 %v583_v3, %v567_v1 }
 0x73b   :  { %1500 = vtanh.f32 %v587_v5 }
 0x744   :  { %v1499_v6 = vpop.eup %1498 }
 0x745   :  { %592 = vrot.lane.b32.xlu0 %v1499_v6, %s1585_s10  ;;  %v201_v6 = vadd.f32 %v1680_v14, %v200_v60 }
 0x748   :  { %v1501_v7 = vpop.eup %1500 }
 0x749   :  { %594 = vrot.lane.b32.xlu1 %v1501_v7, %s1585_s10 }
 0x7b7   :  { %v593_v8 = vpop.permute.xlu0 %592 }
 0x7b8   :  { %v1753_v10 = vmul.f32 %v1495_v55, %v593_v8 }
 0x7bb   :  { %v595_v9 = vpop.permute.xlu1 %594 }
 0x7bc   :  { %v1755_v11 = vmul.f32 %v1497_v58, %v595_v9 }
 0x7be   :  { %v600_v12 = vpack.c.bf16 %v1755_v11, %v1753_v10 }
 0x7c0   :  { %618 = vrot.lane.b32.xlu0 %v600_v12, %s1584_s1  ;;  %v204_v12 = vadd.f32 %v1680_v14, %v203_v62 }
 0x832   :  { %v619_v13 = vpop.permute.xlu0 %618 }
 0x833   :  { %1402 = vmatmul.mubr.msk.bf16.vlgmr.msra.gmra.mxu1 %vm25_vm0, %v619_v13 }
 0x834   :  { %1414 = vmatpush3.bf16.msra.mxu1 %v1639_v2  ;;  %1417 = vmatprep.mubr.msk.bf16.mxu1 %vm1583_vm1, %v1582_v0 }
 0x835   :  { %1415 = vmatprep.subr.bf16.mxu1 %v1582_v0 }
 0x838   :  { %1416 = vmatpush3.bf16.msra.mxu1 %v1648_v4 }
 0x839   :  { %1429 = vmatprep.subr.bf16.mxu1 %v1582_v0 }
 0x8f3   :  { %v657_v16 = vpop.f32.mrf.mxu1 }
 0x8f4   :  { %v664_v17 = vadd.f32 %v657_v16, %v193_v15 }
 0x8f5   :  { %v1403_v18 = vpop.f32.mrf.mxu1 }
 0x8f6   :  { %1502 = vtanh.f32 %v664_v17  ;;  %v1269_v25 = vmul.f32 -1.442695, %v664_v17 }
 0x8f7   :  { %v660_v20 = vpop.f32.mrf.mxu1 }
 0x8f8   :  { %v665_v21 = vadd.f32 %v660_v20, %v196_v19 }
 0x8f9   :  { %v1404_v22 = vpop.f32.mrf.mxu1 }
 0x8fa   :  { %1504 = vtanh.f32 %v665_v21  ;;  %v1270_v26 = vmul.f32 -1.442695, %v665_v21 }
 0x8fb   :  { %1506 = vpow2.f32 %v1269_v25 }
 0x8fc   :  { %1508 = vpow2.f32 %v1270_v26 }
 0x903   :  { %v1503_v23 = vpop.eup %1502 }
 0x904   :  { %684 = vrot.lane.b32.xlu1 %v1503_v23, %s1585_s10 }
 0x907   :  { %v1505_v24 = vpop.eup %1504 }
 0x908   :  { %686 = vrot.lane.b32.xlu0 %v1505_v24, %s1585_s10  ;;  %v1507_v27 = vpop.eup %1506 }
 0x909   :  { %v672_v28 = vadd.f32 1.0, %v1507_v27  ;;  %v1509_v31 = vpop.eup %1508 }
 0x90a   :  { %v673_v32 = vadd.f32 1.0, %v1509_v31 }
 0x90b   :  { %1510 = vrcp.f32 %v672_v28 }
 0x90c   :  { %1512 = vrcp.f32 %v673_v32 }
 0x918   :  { %v1511_v33 = vpop.eup %1510 }
 0x919   :  { %v1513_v36 = vpop.eup %1512  ;;  %v680_v39 = vmul.f32 %v1511_v33, %v586_v63  ;;  %v1817_v63 = vpop.f32.mrf.mxu0 }
 0x91a   :  { %v681_v42 = vmul.f32 %v1513_v36, %v587_v5 }
 0x91b   :  { %v1819_v1 = vpop.f32.mrf.mxu0 }
 0x91d   :  { %v1821_v3 = vpop.f32.mrf.mxu0 }
 0x91f   :  { %v1823_v5 = vpop.f32.mrf.mxu0 }
 0x976   :  { %v685_v34 = vpop.permute.xlu1 %684 }
 0x977   :  { %v690_v35 = vmul.f32 %v1511_v33, %v685_v34 }
 0x979   :  { %694 = vrot.lane.b32.xlu1 %v690_v35, %s1584_s1 }
 0x97a   :  { %v687_v37 = vpop.permute.xlu0 %686 }
 0x97b   :  { %v691_v38 = vmul.f32 %v1513_v36, %v687_v37 }
 0x97d   :  { %696 = vrot.lane.b32.xlu0 %v691_v38, %s1584_s1 }
 0x9eb   :  { %v695_v40 = vpop.permute.xlu1 %694 }
 0x9ec   :  { %v1774_v41 = vadd.f32 %v695_v40, %v680_v39 }
 0x9ee   :  { %1514 = vtanh.f32 %v1774_v41 }
 0x9ef   :  { %v697_v43 = vpop.permute.xlu0 %696 }
 0x9f0   :  { %v1777_v44 = vadd.f32 %v697_v43, %v681_v42 }
 0x9f2   :  { %1516 = vtanh.f32 %v1777_v44 }
 0x9fb   :  { %v1515_v48 = vpop.eup %1514 }
 0x9fc   :  { %706 = vrot.lane.b32.xlu1 %v1515_v48, %s1585_s10 }
 0x9ff   :  { %v1517_v50 = vpop.eup %1516 }
 0xa00   :  { %708 = vrot.lane.b32.xlu0 %v1517_v50, %s1585_s10 }
 0xa6e   :  { %v707_v53 = vpop.permute.xlu1 %706 }
 0xa6f   :  { %v1800_v55 = vmul.f32 %v1511_v33, %v707_v53  ;;  %v212_v53 = vadd.f32 %v1815_v61, %v1680_v14 }
 0xa72   :  { %v709_v54 = vpop.permute.xlu0 %708 }
 0xa73   :  { %v1802_v56 = vmul.f32 %v1513_v36, %v709_v54 }
 0xa75   :  { %v714_v57 = vpack.c.bf16 %v1802_v56, %v1800_v55 }
 0xa77   :  { %732 = vrot.lane.b32.xlu1 %v714_v57, %s1584_s1 }
 0xae9   :  { %v733_v58 = vpop.permute.xlu1 %732 }
 0xaea   :  { %1410 = vmatmul.mubr.msk.bf16.vlgmr.msra.gmra.mxu0 %vm25_vm0, %v733_v58 }
 0xaeb   :  { %1422 = vmatpush3.bf16.msra.mxu0 %v1639_v2  ;;  %1425 = vmatprep.mubr.msk.bf16.mxu0 %vm1583_vm1, %v1582_v0 }
 0xaec   :  { %1423 = vmatprep.subr.bf16.mxu0 %v1582_v0 }
 0xaef   :  { %1424 = vmatpush3.bf16.msra.mxu0 %v1648_v4 }
 0xbaa   :  { %v771_v7 = vpop.f32.mrf.mxu0 }
 0xbab   :  { %v778_v8 = vadd.f32 %v771_v7, %v201_v6 }
 0xbac   :  { %v1411_v9 = vpop.f32.mrf.mxu0 }
 0xbad   :  { %1518 = vtanh.f32 %v778_v8  ;;  %v1276_v19 = vmul.f32 -1.442695, %v778_v8 }
 0xbae   :  { %v774_v13 = vpop.f32.mrf.mxu0 }
 0xbaf   :  { %v779_v15 = vadd.f32 %v774_v13, %v204_v12 }
 0xbb0   :  { %v1412_v16 = vpop.f32.mrf.mxu0 }
 0xbb1   :  { %1520 = vtanh.f32 %v779_v15  ;;  %v1277_v20 = vmul.f32 -1.442695, %v779_v15 }
 0xbb2   :  { %1522 = vpow2.f32 %v1276_v19 }
 0xbb3   :  { %1524 = vpow2.f32 %v1277_v20 }
 0xbba   :  { %v1519_v17 = vpop.eup %1518 }
 0xbbb   :  { %798 = vrot.lane.b32.xlu0 %v1519_v17, %s1585_s10 }
 0xbbe   :  { %v1521_v18 = vpop.eup %1520 }
 0xbbf   :  { %800 = vrot.lane.b32.xlu1 %v1521_v18, %s1585_s10  ;;  %v1523_v21 = vpop.eup %1522 }
 0xbc0   :  { %v786_v22 = vadd.f32 1.0, %v1523_v21  ;;  %v1525_v23 = vpop.eup %1524 }
 0xbc1   :  { %v787_v24 = vadd.f32 1.0, %v1525_v23 }
 0xbc2   :  { %1526 = vrcp.f32 %v786_v22 }
 0xbc3   :  { %1528 = vrcp.f32 %v787_v24 }
 0xbcf   :  { %v1527_v25 = vpop.eup %1526 }
 0xbd0   :  { %v1529_v28 = vpop.eup %1528  ;;  %v794_v33 = vmul.f32 %v1527_v25, %v1774_v41 }
 0xbd1   :  { %v795_v36 = vmul.f32 %v1529_v28, %v1777_v44 }
 0xc2d   :  { %v799_v26 = vpop.permute.xlu0 %798 }
 0xc2e   :  { %v804_v27 = vmul.f32 %v1527_v25, %v799_v26 }
 0xc30   :  { %808 = vrot.lane.b32.xlu0 %v804_v27, %s1584_s1 }
 0xc31   :  { %v801_v31 = vpop.permute.xlu1 %800 }
 0xc32   :  { %v805_v32 = vmul.f32 %v1529_v28, %v801_v31 }
 0xc34   :  { %810 = vrot.lane.b32.xlu1 %v805_v32, %s1584_s1  ;;  %v217_v32 = vadd.f32 %v1680_v14, %v1819_v1 }
 0xca2   :  { %v809_v34 = vpop.permute.xlu0 %808 }
 0xca3   :  { %v814_v35 = vadd.f32 %v809_v34, %v794_v33 }
 0xca5   :  { %1530 = vtanh.f32 %v814_v35 }
 0xca6   :  { %v811_v37 = vpop.permute.xlu1 %810 }
 0xca7   :  { %v815_v38 = vadd.f32 %v811_v37, %v795_v36  ;;  %v220_v36 = vadd.f32 %v1680_v14, %v1823_v5 }
 0xca9   :  { %1532 = vtanh.f32 %v815_v38 }
 0xcb2   :  { %v1531_v39 = vpop.eup %1530 }
 0xcb3   :  { %820 = vrot.lane.b32.xlu0 %v1531_v39, %s1585_s10 }
 0xcb6   :  { %v1533_v40 = vpop.eup %1532 }
 0xcb7   :  { %822 = vrot.lane.b32.xlu1 %v1533_v40, %s1585_s10 }
 0xd25   :  { %v821_v42 = vpop.permute.xlu0 %820 }
 0xd26   :  { %v1835_v45 = vmul.f32 %v1527_v25, %v821_v42 }
 0xd29   :  { %v823_v43 = vpop.permute.xlu1 %822 }
 0xd2a   :  { %v1837_v46 = vmul.f32 %v1529_v28, %v823_v43 }
 0xd2c   :  { %v828_v41 = vpack.c.bf16 %v1837_v46, %v1835_v45 }
 0xd2e   :  { %846 = vrot.lane.b32.xlu0 %v828_v41, %s1584_s1 }
 0xda0   :  { %v847_v44 = vpop.permute.xlu0 %846 }
 0xda1   :  { %1418 = vmatmul.mubr.msk.bf16.vlgmr.msra.gmra.mxu1 %vm25_vm0, %v847_v44 }
 0xda2   :  { %1430 = vmatpush3.bf16.msra.mxu1 %v1639_v2  ;;  %1433 = vmatprep.mubr.msk.bf16.mxu1 %vm1583_vm1, %v1582_v0 }
 0xda3   :  { %1431 = vmatprep.subr.bf16.mxu1 %v1582_v0 }
 0xda6   :  { %1432 = vmatpush3.bf16.msra.mxu1 %v1648_v4 }
 0xe61   :  { %v885_v48 = vpop.f32.mrf.mxu1 }
 0xe62   :  { %v892_v49 = vadd.f32 %v885_v48, %v209_v47 }
 0xe63   :  { %v1419_v50 = vpop.f32.mrf.mxu1 }
 0xe64   :  { %1534 = vtanh.f32 %v892_v49  ;;  %v1283_v4 = vmul.f32 -1.442695, %v892_v49 }
 0xe65   :  { %v888_v54 = vpop.f32.mrf.mxu1 }
 0xe66   :  { %v893_v57 = vadd.f32 %v888_v54, %v212_v53 }
 0xe67   :  { %v1420_v2 = vpop.f32.mrf.mxu1 }
 0xe68   :  { %1536 = vtanh.f32 %v893_v57  ;;  %v1284_v59 = vmul.f32 -1.442695, %v893_v57 }
 0xe69   :  { %1538 = vpow2.f32 %v1283_v4 }
 0xe6a   :  { %1540 = vpow2.f32 %v1284_v59 }
 0xe71   :  { %v1535_v58 = vpop.eup %1534 }
 0xe72   :  { %912 = vrot.lane.b32.xlu1 %v1535_v58, %s1585_s10 }
 0xe75   :  { %v1537_v0 = vpop.eup %1536 }
 0xe76   :  { %914 = vrot.lane.b32.xlu0 %v1537_v0, %s1585_s10  ;;  %v1539_v60 = vpop.eup %1538 }
 0xe77   :  { %v900_v62 = vadd.f32 1.0, %v1539_v60  ;;  %v1541_v6 = vpop.eup %1540 }
 0xe78   :  { %v901_v61 = vadd.f32 1.0, %v1541_v6 }
 0xe79   :  { %1542 = vrcp.f32 %v900_v62 }
 0xe7a   :  { %1544 = vrcp.f32 %v901_v61 }
 0xe86   :  { %v1543_v7 = vpop.eup %1542 }
 0xe87   :  { %v1545_v12 = vpop.eup %1544  ;;  %v908_v16 = vmul.f32 %v1543_v7, %v814_v35 }
 0xe88   :  { %v909_v19 = vmul.f32 %v1545_v12, %v815_v38 }
 0xee4   :  { %v913_v8 = vpop.permute.xlu1 %912 }
 0xee5   :  { %v918_v9 = vmul.f32 %v1543_v7, %v913_v8 }
 0xee7   :  { %922 = vrot.lane.b32.xlu1 %v918_v9, %s1584_s1 }
 0xee8   :  { %v915_v13 = vpop.permute.xlu0 %914 }
 0xee9   :  { %v919_v15 = vmul.f32 %v1545_v12, %v915_v13 }
 0xeeb   :  { %924 = vrot.lane.b32.xlu0 %v919_v15, %s1584_s1  ;;  %v225_v15 = vadd.f32 %v1817_v63, %v1680_v14 }
 0xf59   :  { %v923_v17 = vpop.permute.xlu1 %922 }
 0xf5a   :  { %v928_v18 = vadd.f32 %v923_v17, %v908_v16 }
 0xf5c   :  { %1546 = vtanh.f32 %v928_v18 }
 0xf5d   :  { %v925_v20 = vpop.permute.xlu0 %924 }
 0xf5e   :  { %v929_v21 = vadd.f32 %v925_v20, %v909_v19  ;;  %v228_v19 = vadd.f32 %v1821_v3, %v1680_v14 }
 0xf60   :  { %1548 = vtanh.f32 %v929_v21 }
 0xf69   :  { %v1547_v22 = vpop.eup %1546 }
 0xf6a   :  { %934 = vrot.lane.b32.xlu1 %v1547_v22, %s1585_s10 }
 0xf6d   :  { %v1549_v23 = vpop.eup %1548 }
 0xf6e   :  { %936 = vrot.lane.b32.xlu0 %v1549_v23, %s1585_s10 }
 0xfdc   :  { %v935_v24 = vpop.permute.xlu1 %934 }
 0xfdd   :  { %v1858_v26 = vmul.f32 %v1543_v7, %v935_v24 }
 0xfe0   :  { %v937_v25 = vpop.permute.xlu0 %936 }
 0xfe1   :  { %v1860_v27 = vmul.f32 %v1545_v12, %v937_v25 }
 0xfe3   :  { %v942_v28 = vpack.c.bf16 %v1860_v27, %v1858_v26 }
 0xfe5   :  { %960 = vrot.lane.b32.xlu1 %v942_v28, %s1584_s1 }
0x1057   :  { %v961_v31 = vpop.permute.xlu1 %960 }
0x1058   :  { %1426 = vmatmul.mubr.msk.bf16.vlgmr.msra.gmra.mxu0 %vm25_vm0, %v961_v31 }
0x1118   :  { %v999_v33 = vpop.f32.mrf.mxu0 }
0x1119   :  { %v1006_v34 = vadd.f32 %v999_v33, %v217_v32 }
0x111a   :  { %v1427_v35 = vpop.f32.mrf.mxu0 }
0x111b   :  { %1550 = vtanh.f32 %v1006_v34  ;;  %v1290_v43 = vmul.f32 -1.442695, %v1006_v34 }
0x111c   :  { %v1002_v37 = vpop.f32.mrf.mxu0 }
0x111d   :  { %v1007_v38 = vadd.f32 %v1002_v37, %v220_v36 }
0x111e   :  { %v1428_v39 = vpop.f32.mrf.mxu0 }
0x111f   :  { %1552 = vtanh.f32 %v1007_v38  ;;  %v1291_v1 = vmul.f32 -1.442695, %v1007_v38 }
0x1120   :  { %1554 = vpow2.f32 %v1290_v43 }
0x1121   :  { %1556 = vpow2.f32 %v1291_v1 }
0x1128   :  { %v1551_v40 = vpop.eup %1550 }
0x1129   :  { %1026 = vrot.lane.b32.xlu0 %v1551_v40, %s1585_s10 }
0x112c   :  { %v1553_v42 = vpop.eup %1552 }
0x112d   :  { %1028 = vrot.lane.b32.xlu1 %v1553_v42, %s1585_s10  ;;  %v1555_v41 = vpop.eup %1554 }
0x112e   :  { %v1014_v44 = vadd.f32 1.0, %v1555_v41  ;;  %v1557_v47 = vpop.eup %1556 }
0x112f   :  { %v1015_v5 = vadd.f32 1.0, %v1557_v47  ;;  %v1303_v47 = vpack.c.bf16 %v1690_v51, %v1690_v51  ;;  %v1308_v51 = vpack.c.bf16 %v1755_v11, %v1755_v11  ;;  %v1313_v11 = vpack.c.bf16 %v1858_v26, %v1858_v26 }
0x1130   :  { %1558 = vrcp.f32 %v1014_v44 }
0x1131   :  { %1560 = vrcp.f32 %v1015_v5  ;;  %v1304_v5 = vpack.c.bf16 %v1692_v52, %v1692_v52  ;;  %v1309_v52 = vpack.c.bf16 %v1800_v55, %v1800_v55  ;;  %v1314_v55 = vpack.c.bf16 %v1860_v27, %v1860_v27 }
0x113d   :  { %v1559_v48 = vpop.eup %1558 }
0x113e   :  { %v1561_v53 = vpop.eup %1560  ;;  %v1022_v2 = vmul.f32 %v1559_v48, %v928_v18 }
0x113f   :  { %v1023_v4 = vmul.f32 %v1561_v53, %v929_v21 }
0x119b   :  { %v1027_v49 = vpop.permute.xlu0 %1026 }
0x119c   :  { %v1032_v50 = vmul.f32 %v1559_v48, %v1027_v49  ;;  %v1306_v49 = vpack.c.bf16 %v1729_v30, %v1729_v30  ;;  %v1311_v30 = vpack.c.bf16 %v1835_v45, %v1835_v45 }
0x119e   :  { %1036 = vrot.lane.b32.xlu0 %v1032_v50, %s1584_s1  ;;  %v1307_v50 = vpack.c.bf16 %v1753_v10, %v1753_v10  ;;  %v1312_v10 = vpack.c.bf16 %v1837_v46, %v1837_v46 }
0x119f   :  { %v1029_v54 = vpop.permute.xlu1 %1028 }
0x11a0   :  { %v1033_v57 = vmul.f32 %v1561_v53, %v1029_v54 }
0x11a2   :  { %1038 = vrot.lane.b32.xlu1 %v1033_v57, %s1584_s1 }
0x1210   :  { %v1037_v58 = vpop.permute.xlu0 %1036 }
0x1211   :  { %v1042_v0 = vadd.f32 %v1037_v58, %v1022_v2 }
0x1213   :  { %1562 = vtanh.f32 %v1042_v0 }
0x1214   :  { %v1039_v59 = vpop.permute.xlu1 %1038 }
0x1215   :  { %v1043_v60 = vadd.f32 %v1039_v59, %v1023_v4 }
0x1217   :  { %1564 = vtanh.f32 %v1043_v60 }
0x1220   :  { %v1563_v62 = vpop.eup %1562 }
0x1221   :  { %1048 = vrot.lane.b32.xlu0 %v1563_v62, %s1585_s10 }
0x1224   :  { %v1565_v6 = vpop.eup %1564 }
0x1225   :  { %1050 = vrot.lane.b32.xlu1 %v1565_v6, %s1585_s10 }
0x1293   :  { %v1049_v61 = vpop.permute.xlu0 %1048 }
0x1294   :  { %v1876_v8 = vmul.f32 %v1559_v48, %v1049_v61  ;;  %v1305_v48 = vpack.c.bf16 %v1727_v29, %v1727_v29  ;;  %v1310_v29 = vpack.c.bf16 %v1802_v56, %v1802_v56 }
0x1296   :  { %v1315_v46 = vpack.c.bf16 %v1876_v8, %v1876_v8 }
0x1297   :  { %v1051_v7 = vpop.permute.xlu1 %1050 }
0x1298   :  { %v1878_v9 = vmul.f32 %v1561_v53, %v1051_v7 }
0x129a   :  { %v1056_v12 = vpack.c.bf16 %v1878_v9, %v1876_v8  ;;  %v1316_v2 = vpack.c.bf16 %v1878_v9, %v1878_v9 }
0x129c   :  { %1074 = vrot.lane.b32.xlu0 %v1056_v12, %s1584_s1 }
0x130e   :  { %v1075_v13 = vpop.permute.xlu0 %1074 }
0x130f   :  { %1434 = vmatmul.mubr.msk.bf16.vlgmr.msra.gmra.mxu1 %vm25_vm0, %v1075_v13 }
0x13cf   :  { %v1113_v16 = vpop.f32.mrf.mxu1 }
0x13d0   :  { %v1120_v17 = vadd.f32 %v1113_v16, %v225_v15 }
0x13d1   :  { %v1435_v18 = vpop.f32.mrf.mxu1 }
0x13d2   :  { %1566 = vtanh.f32 %v1120_v17  ;;  %v1297_v25 = vmul.f32 -1.442695, %v1120_v17 }
0x13d3   :  { %v1116_v20 = vpop.f32.mrf.mxu1 }
0x13d4   :  { %v1121_v21 = vadd.f32 %v1116_v20, %v228_v19 }
0x13d5   :  { %v1436_v22 = vpop.f32.mrf.mxu1 }
0x13d6   :  { %1568 = vtanh.f32 %v1121_v21  ;;  %v1298_v63 = vmul.f32 -1.442695, %v1121_v21 }
0x13d7   :  { %1570 = vpow2.f32 %v1297_v25 }
0x13d8   :  { %1572 = vpow2.f32 %v1298_v63 }
0x13df   :  { %v1567_v23 = vpop.eup %1566 }
0x13e0   :  { %1140 = vrot.lane.b32.xlu1 %v1567_v23, %s1585_s10 }
0x13e3   :  { %v1569_v24 = vpop.eup %1568 }
0x13e4   :  { %1142 = vrot.lane.b32.xlu0 %v1569_v24, %s1585_s10  ;;  %v1571_v28 = vpop.eup %1570 }
0x13e5   :  { %v1128_v31 = vadd.f32 1.0, %v1571_v28  ;;  %v1573_v32 = vpop.eup %1572 }
0x13e6   :  { %v1129_v14 = vadd.f32 1.0, %v1573_v32 }
0x13e7   :  { %1574 = vrcp.f32 %v1128_v31 }
0x13e8   :  { %1576 = vrcp.f32 %v1129_v14 }
0x13f4   :  { %v1575_v3 = vpop.eup %1574 }
0x13f5   :  { %v1577_v35 = vpop.eup %1576  ;;  %v1136_v38 = vmul.f32 %v1575_v3, %v1042_v0 }
0x13f6   :  { %v1137_v42 = vmul.f32 %v1577_v35, %v1043_v60 }
0x1452   :  { %v1141_v33 = vpop.permute.xlu1 %1140 }
0x1453   :  { %v1146_v34 = vmul.f32 %v1575_v3, %v1141_v33 }
0x1455   :  { %1150 = vrot.lane.b32.xlu1 %v1146_v34, %s1584_s1 }
0x1456   :  { %v1143_v36 = vpop.permute.xlu0 %1142 }
0x1457   :  { %v1147_v37 = vmul.f32 %v1577_v35, %v1143_v36 }
0x1459   :  { %1152 = vrot.lane.b32.xlu0 %v1147_v37, %s1584_s1 }
0x14c7   :  { %v1151_v39 = vpop.permute.xlu1 %1150 }
0x14c8   :  { %v1156_v40 = vadd.f32 %v1151_v39, %v1136_v38 }
0x14ca   :  { %1578 = vtanh.f32 %v1156_v40 }
0x14cb   :  { %v1153_v43 = vpop.permute.xlu0 %1152 }
0x14cc   :  { %v1157_v1 = vadd.f32 %v1153_v43, %v1137_v42 }
0x14ce   :  { %1580 = vtanh.f32 %v1157_v1 }
0x14d7   :  { %v1579_v41 = vpop.eup %1578 }
0x14d8   :  { %1162 = vrot.lane.b32.xlu1 %v1579_v41, %s1585_s10 }
0x14db   :  { %v1581_v44 = vpop.eup %1580 }
0x14dc   :  { %1197 = vrot.lane.b32.xlu1 %v1156_v40, %s1586_s0  ;;  %1164 = vrot.lane.b32.xlu0 %v1581_v44, %s1585_s10 }
0x14e0   :  { %378 = vrot.lane.b32.xlu1 %v1303_v47, %s1584_s1  ;;  %1199 = vrot.lane.b32.xlu0 %v1157_v1, %s1586_s0 }
0x14e4   :  { %492 = vrot.lane.b32.xlu1 %v1305_v48, %s1584_s1  ;;  %380 = vrot.lane.b32.xlu0 %v1304_v5, %s1584_s1 }
0x14e8   :  { %606 = vrot.lane.b32.xlu1 %v1307_v50, %s1584_s1  ;;  %494 = vrot.lane.b32.xlu0 %v1306_v49, %s1584_s1 }
0x14ec   :  { %720 = vrot.lane.b32.xlu1 %v1309_v52, %s1584_s1  ;;  %608 = vrot.lane.b32.xlu0 %v1308_v51, %s1584_s1 }
0x14f0   :  { %834 = vrot.lane.b32.xlu1 %v1311_v30, %s1584_s1  ;;  %722 = vrot.lane.b32.xlu0 %v1310_v29, %s1584_s1 }
0x14f4   :  { %948 = vrot.lane.b32.xlu1 %v1313_v11, %s1584_s1  ;;  %836 = vrot.lane.b32.xlu0 %v1312_v10, %s1584_s1 }
0x14f8   :  { %950 = vrot.lane.b32.xlu0 %v1314_v55, %s1584_s1 }
0x154a   :  { %v1163_v56 = vpop.permute.xlu1 %1162 }
0x154b   :  { %v1168_v45 = vmul.f32 %v1575_v3, %v1163_v56 }
0x154d   :  { %1187 = vrot.lane.b32.xlu1 %v1168_v45, %s1584_s1  ;;  %v1317_v58 = vpack.c.bf16 %v1168_v45, %v1168_v45 }
0x154e   :  { %v1198_v53 = vpop.permute.xlu1 %1197  ;;  %v1165_v54 = vpop.permute.xlu0 %1164 }
0x154f   :  { %1203 = vst.msk [vmem:[#allocation3] sm:$0xff] %vm25_vm0, %v1198_v53  ;;  %v1169_v26 = vmul.f32 %v1577_v35, %v1165_v54 }
0x1551   :  { %1062 = vrot.lane.b32.xlu1 %v1315_v46, %s1584_s1  ;;  %1189 = vrot.lane.b32.xlu0 %v1169_v26, %s1584_s1  ;;  %v1318_v60 = vpack.c.bf16 %v1169_v26, %v1169_v26 }
0x1552   :  { %v379_v27 = vpop.permute.xlu1 %378  ;;  %v1200_v57 = vpop.permute.xlu0 %1199 }
0x1553   :  { %385 = vst.msk [vmem:[%s2028_s4] sm:$0xf] %vm384_vm2, %v379_v27 }
0x1554   :  { %1204 = vst.msk [vmem:[#allocation3 + $0x8] sm:$0xff] %vm25_vm0, %v1200_v57 }
0x1555   :  { %1176 = vrot.lane.b32.xlu1 %v1317_v58, %s1584_s1  ;;  %1064 = vrot.lane.b32.xlu0 %v1316_v2, %s1584_s1 }
0x1556   :  { %v1212_v0 = vld [vmem:[#allocation3] sm:$0xff]  ;;  %v493_v4 = vpop.permute.xlu1 %492  ;;  %v381_v59 = vpop.permute.xlu0 %380 }
0x1557   :  { %1214 = vst.msk [vmem:[%s2029_s6] sm:$0xff] %vm25_vm0, %v1212_v0 }
0x1558   :  { %1259 = vst.msk [vmem:[%s2028_s4 + $0x8] sm:$0xf] %vm384_vm2, %v493_v4  ;;  %386 = vst.msk [vmem:[%s2028_s4 + $0x4] sm:$0xf] %vm384_vm2, %v381_v59 }
0x1559   :  { %1178 = vrot.lane.b32.xlu0 %v1318_v60, %s1584_s1 }
0x155a   :  { %v607_v6 = vpop.permute.xlu1 %606  ;;  %v495_v61 = vpop.permute.xlu0 %494 }
0x155b   :  { %v1213_v62 = vld [vmem:[#allocation3 + $0x8] sm:$0xff]  ;;  %1266 = vst.msk [vmem:[%s2028_s4 + $0x10] sm:$0xf] %vm384_vm2, %v607_v6  ;;  %1260 = vst.msk [vmem:[%s2028_s4 + $0xc] sm:$0xf] %vm384_vm2, %v495_v61 }
0x155c   :  { %1215 = vst.msk [vmem:[%s2029_s6 + $0x8] sm:$0xff] %vm25_vm0, %v1213_v62 }
0x155e   :  { %v721_v7 = vpop.permute.xlu1 %720  ;;  %v609_v8 = vpop.permute.xlu0 %608 }
0x155f   :  { %1273 = vst.msk [vmem:[%s2028_s4 + $0x18] sm:$0xf] %vm384_vm2, %v721_v7  ;;  %1267 = vst.msk [vmem:[%s2028_s4 + $0x14] sm:$0xf] %vm384_vm2, %v609_v8 }
0x1562   :  { %v835_v9 = vpop.permute.xlu1 %834  ;;  %v723_v12 = vpop.permute.xlu0 %722 }
0x1563   :  { %1280 = vst.msk [vmem:[%s2028_s4 + $0x20] sm:$0xf] %vm384_vm2, %v835_v9  ;;  %1274 = vst.msk [vmem:[%s2028_s4 + $0x1c] sm:$0xf] %vm384_vm2, %v723_v12 }
0x1566   :  { %v949_v13 = vpop.permute.xlu1 %948  ;;  %v837_v15 = vpop.permute.xlu0 %836 }
0x1567   :  { %1287 = vst.msk [vmem:[%s2028_s4 + $0x28] sm:$0xf] %vm384_vm2, %v949_v13  ;;  %1281 = vst.msk [vmem:[%s2028_s4 + $0x24] sm:$0xf] %vm384_vm2, %v837_v15 }
0x156a   :  { %v951_v16 = vpop.permute.xlu0 %950 }
0x156b   :  { %1288 = vst.msk [vmem:[%s2028_s4 + $0x2c] sm:$0xf] %vm384_vm2, %v951_v16 }
0x15bf   :  { %v1188_v17 = vpop.permute.xlu1 %1187 }
0x15c0   :  { %1193 = vst.msk [vmem:[#allocation2] sm:$0xff] %vm25_vm0, %v1188_v17 }
0x15c3   :  { %v1063_v18 = vpop.permute.xlu1 %1062  ;;  %v1190_v19 = vpop.permute.xlu0 %1189 }
0x15c4   :  { %1294 = vst.msk [vmem:[%s2028_s4 + $0x30] sm:$0xf] %vm384_vm2, %v1063_v18 }
0x15c5   :  { %1194 = vst.msk [vmem:[#allocation2 + $0x8] sm:$0xff] %vm25_vm0, %v1190_v19 }
0x15c7   :  { %v1208_v20 = vld [vmem:[#allocation2] sm:$0xff]  ;;  %v1177_v21 = vpop.permute.xlu1 %1176  ;;  %v1065_v22 = vpop.permute.xlu0 %1064 }
0x15c8   :  { %1210 = vst.msk [vmem:[%s2030_s5] sm:$0xff] %vm25_vm0, %v1208_v20 }
0x15c9   :  { %1301 = vst.msk [vmem:[%s2028_s4 + $0x38] sm:$0xf] %vm384_vm2, %v1177_v21  ;;  %1295 = vst.msk [vmem:[%s2028_s4 + $0x34] sm:$0xf] %vm384_vm2, %v1065_v22 }
0x15cb   :  { %v1179_v24 = vpop.permute.xlu0 %1178 }
0x15cc   :  { %v1209_v23 = vld [vmem:[#allocation2 + $0x8] sm:$0xff]  ;;  %1302 = vst.msk [vmem:[%s2028_s4 + $0x3c] sm:$0xf] %vm384_vm2, %v1179_v24 }
0x15cd   :  { %1211 = vst.msk [vmem:[%s2030_s5 + $0x8] sm:$0xff] %vm25_vm0, %v1209_v23 }

</bundles_post_ra>
